<compile_context>
chip_gen: v7x
topology: tpu7x:2x2x1
jax: 0.10.0
libtpu: 0.0.40
codegen_flags: <defaults>
</compile_context>

<pallas_src>
import functools

import jax
import jax.numpy as jnp
from jax.experimental import pallas as pl
from jax.experimental.pallas import tpu as pltpu


def _round_up(v, m):
    return ((v + m - 1) // m) * m


# ------------- Kernel 1: fused 3-branch Linear + ReLU + (1/3,1/3,1/3) mix ------------------
def _branch_mlp_kernel(x_ref, w_ref, b_ref, h_ref):
    # x: (TM, Fp) bf16 ; w: (Fp, 3*Hp) bf16 ; b: (1, 3*Hp) f32 ; h: (TM, Hp) bf16
    z = jnp.dot(x_ref[...], w_ref[...], preferred_element_type=jnp.float32) + b_ref[...]
    z = jnp.maximum(z, 0.0)                                   # ReLU in f32 on the VPU
    hp = h_ref.shape[1]
    mixed = (z[:, :hp] + z[:, hp:2 * hp] + z[:, 2 * hp:3 * hp]) * (1.0 / 3.0)
    h_ref[...] = mixed.astype(h_ref.dtype)


# ------------- Kernel 2: tiled propagation  out = A_hat @ h  -------------------------------
def _propagate_kernel(a_ref, h_ref, o_ref, acc_ref):
    @pl.when(pl.program_id(1) == 0)
    def _():
        acc_ref[...] = jnp.zeros_like(acc_ref)

    acc_ref[...] += jnp.dot(a_ref[...], h_ref[...], preferred_element_type=jnp.float32)

    @pl.when(pl.program_id(1) == pl.num_programs(1) - 1)
    def _():
        o_ref[...] = acc_ref[...].astype(o_ref.dtype)


def _log_softmax_masked(logits, num_classes):
    col = jax.lax.broadcasted_iota(jnp.int32, logits.shape, 1)
    logits = jnp.where(col < num_classes, logits, -1e30)      # ignore padded class lanes
    m = jnp.max(logits, axis=1, keepdims=True)
    s = logits - m
    lse = jnp.log(jnp.sum(jnp.exp(s), axis=1, keepdims=True))
    return s - lse


# ------------- Kernel 3: last propagation step fused with Linear + log_softmax -------------
def _propagate_classify_kernel(a_ref, h_ref, w_ref, b_ref, o_ref, acc_ref, *, num_classes):
    @pl.when(pl.program_id(1) == 0)
    def _():
        acc_ref[...] = jnp.zeros_like(acc_ref)

    acc_ref[...] += jnp.dot(a_ref[...], h_ref[...], preferred_element_type=jnp.float32)

    @pl.when(pl.program_id(1) == pl.num_programs(1) - 1)
    def _():
        logits = jnp.dot(acc_ref[...].astype(w_ref.dtype), w_ref[...],
                         preferred_element_type=jnp.float32) + b_ref[...]
        o_ref[...] = _log_softmax_masked(logits, num_classes)


# ------------- Kernel 4: classify-only (used when inc2 == 0) -------------------------------
def _classify_kernel(h_ref, w_ref, b_ref, o_ref, *, num_classes):
    logits = jnp.dot(h_ref[...], w_ref[...], preferred_element_type=jnp.float32) + b_ref[...]
    o_ref[...] = _log_softmax_masked(logits, num_classes)


# ------------------------------------- wrapper ---------------------------------------------
def afgcn_forward(x, edge_index, params, *, inc2=2, tile=256):
    n, f = x.shape
    hidden = params["w11"].shape[1]
    num_classes = params["w1"].shape[1]

    fp = _round_up(f, 128)
    hp = _round_up(hidden, 128)
    cp = _round_up(num_classes, 128)
    n_pad = _round_up(n, tile)

    # ---- GCN-normalized adjacency with self-loops (plain-JAX glue; dense build is O(N^2)) --
    src, dst = edge_index[0], edge_index[1]
    a = jnp.zeros((n, n), jnp.float32).at[dst, src].set(1.0)
    a = jnp.maximum(a, jnp.eye(n, dtype=jnp.float32))          # add self loops
    deg = jnp.sum(a, axis=1)
    dis = jnp.where(deg > 0, jax.lax.rsqrt(deg), 0.0)
    a_hat = a * dis[:, None] * dis[None, :]
    a_hat = jnp.pad(a_hat, ((0, n_pad - n), (0, n_pad - n))).astype(jnp.bfloat16)

    # ---- pad / pack operands so every lane dimension is a multiple of 128 ------------------
    def pad_w(w, r, c):
        return jnp.pad(w, ((0, r - w.shape[0]), (0, c - w.shape[1])))

    def pad_b(b, c):
        b = b.reshape(1, -1)
        return jnp.pad(b, ((0, 0), (0, c - b.shape[1]))).astype(jnp.float32)

    x_p = jnp.pad(x, ((0, n_pad - n), (0, fp - f))).astype(jnp.bfloat16)
    w_cat = jnp.concatenate(
        [pad_w(params["w11"], fp, hp),
         pad_w(params["w12"], fp, hp),
         pad_w(params["w13"], fp, hp)], axis=1).astype(jnp.bfloat16)
    b_cat = jnp.concatenate(
        [pad_b(params["b11"], hp),
         pad_b(params["b12"], hp),
         pad_b(params["b13"], hp)], axis=1)
    w1_p = pad_w(params["w1"], hp, cp).astype(jnp.bfloat16)
    b1_p = pad_b(params["b1"], cp)

    row_grid = n_pad // tile

    # ---- Stage 1: h = (relu(x W11+b11) + relu(x W12+b12) + relu(x W13+b13)) / 3 ------------
    h = pl.pallas_call(
        _branch_mlp_kernel,
        out_shape=jax.ShapeDtypeStruct((n_pad, hp), jnp.bfloat16),
        grid=(row_grid,),
        in_specs=[pl.BlockSpec((tile, fp), lambda i: (i, 0)),
                  pl.BlockSpec((fp, 3 * hp), lambda i: (0, 0)),
                  pl.BlockSpec((1, 3 * hp), lambda i: (0, 0))],
        out_specs=pl.BlockSpec((tile, hp), lambda i: (i, 0)),
        compiler_params=pltpu.CompilerParams(dimension_semantics=("parallel",)),
    )(x_p, w_cat, b_cat)

    if inc2 == 0:
        # ---- no propagation: classify directly ---------------------------------------------
        out_p = pl.pallas_call(
            functools.partial(_classify_kernel, num_classes=num_classes),
            out_shape=jax.ShapeDtypeStruct((n_pad, cp), jnp.float32),
            grid=(row_grid,),
            in_specs=[pl.BlockSpec((tile, hp), lambda i: (i, 0)),
                      pl.BlockSpec((hp, cp), lambda i: (0, 0)),
                      pl.BlockSpec((1, cp), lambda i: (0, 0))],
            out_specs=pl.BlockSpec((tile, cp), lambda i: (i, 0)),
            compiler_params=pltpu.CompilerParams(dimension_semantics=("parallel",)),
        )(h, w1_p, b1_p)
        return out_p[:n, :num_classes]

    # ---- Stage 2: (inc2 - 1) plain propagation steps  h <- A_hat @ h -----------------------
    propagate = pl.pallas_call(
        _propagate_kernel,
        out_shape=jax.ShapeDtypeStruct((n_pad, hp), jnp.bfloat16),
        grid=(row_grid, row_grid),
        in_specs=[pl.BlockSpec((tile, tile), lambda i, k: (i, k)),
                  pl.BlockSpec((tile, hp), lambda i, k: (k, 0))],
        out_specs=pl.BlockSpec((tile, hp), lambda i, k: (i, 0)),
        scratch_shapes=[pltpu.VMEM((tile, hp), jnp.float32)],
        compiler_params=pltpu.CompilerParams(
            dimension_semantics=("parallel", "arbitrary")),
    )
    for _ in range(inc2 - 1):
        h = propagate(a_hat, h)

    # ---- Stage 3: last propagation step fused with lin1 + log_softmax ----------------------
    out_p = pl.pallas_call(
        functools.partial(_propagate_classify_kernel, num_classes=num_classes),
        out_shape=jax.ShapeDtypeStruct((n_pad, cp), jnp.float32),
        grid=(row_grid, row_grid),
        in_specs=[pl.BlockSpec((tile, tile), lambda i, k: (i, k)),
                  pl.BlockSpec((tile, hp), lambda i, k: (k, 0)),
                  pl.BlockSpec((hp, cp), lambda i, k: (0, 0)),
                  pl.BlockSpec((1, cp), lambda i, k: (0, 0))],
        out_specs=pl.BlockSpec((tile, cp), lambda i, k: (i, 0)),
        scratch_shapes=[pltpu.VMEM((tile, hp), jnp.float32)],
        compiler_params=pltpu.CompilerParams(
            dimension_semantics=("parallel", "arbitrary")),
    )(a_hat, h, w1_p, b1_p)

    return out_p[:n, :num_classes]


# ------------------------------ pure-JAX reference & init ----------------------------------
def _afgcn_reference(x, edge_index, params, inc2):
    n = x.shape[0]
    a = jnp.zeros((n, n), jnp.float32).at[edge_index[1], edge_index[0]].set(1.0)
    a = jnp.maximum(a, jnp.eye(n, dtype=jnp.float32))
    deg = jnp.sum(a, axis=1)
    dis = jnp.where(deg > 0, jax.lax.rsqrt(deg), 0.0)
    a_hat = a * dis[:, None] * dis[None, :]

    def branch(w, b):
        return jax.nn.relu(x @ w + b)

    h = (branch(params["w11"], params["b11"])
         + branch(params["w12"], params["b12"])
         + branch(params["w13"], params["b13"])) / 3.0
    for _ in range(inc2):
        h = a_hat @ h
    return jax.nn.log_softmax(h @ params["w1"] + params["b1"], axis=1)


def init_params(key, num_features, hidden, num_classes):
    ks = jax.random.split(key, 8)

    def lin(kw, kb, fan_in, fan_out):
        lim = 1.0 / (fan_in ** 0.5)
        w = jax.random.uniform(kw, (fan_in, fan_out), jnp.float32, -lim, lim)
        b = jax.random.uniform(kb, (fan_out,), jnp.float32, -lim, lim)
        return w, b

    w11, b11 = lin(ks[0], ks[1], num_features, hidden)
    w12, b12 = lin(ks[2], ks[3], num_features, hidden)
    w13, b13 = lin(ks[4], ks[5], num_features, hidden)
    w1, b1 = lin(ks[6], ks[7], hidden, num_classes)
    return dict(w11=w11, b11=b11, w12=w12, b12=b12, w13=w13, b13=b13, w1=w1, b1=b1)


if __name__ == "__main__":
    key = jax.random.PRNGKey(0)
    N, F_IN, HIDDEN, NUM_CLASSES, INC2 = 16, 8, 32, 4, 2

    k_x, k_e, k_p = jax.random.split(key, 3)
    x = jax.random.normal(k_x, (N, F_IN), jnp.float32)

    # Deterministic small graph: bidirectional ring + a few extra edges.
    ring_src = jnp.arange(N, dtype=jnp.int32)
    ring_dst = (ring_src + 1) % N
    extra_src = jax.random.randint(k_e, (8,), 0, N, jnp.int32)
    extra_dst = (extra_src + 5) % N
    src = jnp.concatenate([ring_src, ring_dst, extra_src])
    dst = jnp.concatenate([ring_dst, ring_src, extra_dst])
    edge_index = jnp.stack([src, dst], axis=0)

    params = init_params(k_p, F_IN, HIDDEN, NUM_CLASSES)

    fwd = jax.jit(afgcn_forward, static_argnames=("inc2", "tile"))
    out = jax.block_until_ready(fwd(x, edge_index, params, inc2=INC2, tile=256))
    assert out.shape == (N, NUM_CLASSES)
    assert bool(jnp.all(jnp.isfinite(out)))

    ref = _afgcn_reference(x, edge_index, params, INC2)
    assert jnp.allclose(out, ref, atol=1e-1, rtol=1e-1), float(jnp.max(jnp.abs(out - ref)))

    print("KERNEL_OK")
</pallas_src>

<mosaic_0001>
module attributes {stable_mosaic.version = 11 : i64} {
  func.func @_branch_mlp_kernel(%arg0: i32, %arg1: memref<256x128xbf16, #tpu.memory_space<vmem>>, %arg2: memref<128x384xbf16, #tpu.memory_space<vmem>>, %arg3: memref<1x384xf32, #tpu.memory_space<vmem>>, %arg4: memref<256x128xbf16, #tpu.memory_space<vmem>>) attributes {dimension_semantics = [#tpu.dimension_semantics<parallel>], iteration_bounds = array<i64: 1>, scalar_prefetch = 0 : i64, scratch_operands = 0 : i64, tpu.core_type = #tpu.core_type<tc>, window_params = [{transform_indices = @transform_0, window_bounds = array<i64: 256, 128>}, {pipeline_mode = #tpu.pipeline_mode<synchronous>, transform_indices = @transform_1, window_bounds = array<i64: 128, 384>}, {pipeline_mode = #tpu.pipeline_mode<synchronous>, transform_indices = @transform_2, window_bounds = array<i64: 1, 384>}, {transform_indices = @transform_3, window_bounds = array<i64: 256, 128>}]} {
    %c0 = arith.constant 0 : index
    %c0_0 = arith.constant 0 : index
    %0 = vector.load %arg1[%c0, %c0_0] : memref<256x128xbf16, #tpu.memory_space<vmem>>, vector<256x128xbf16>
    %c0_1 = arith.constant 0 : index
    %c0_2 = arith.constant 0 : index
    %1 = vector.load %arg2[%c0_1, %c0_2] : memref<128x384xbf16, #tpu.memory_space<vmem>>, vector<128x384xbf16>
    %cst = arith.constant dense<0.000000e+00> : vector<256x384xf32>
    %2 = tpu.matmul %0, %1, %cst {dimension_numbers = #tpu.dot_dimension_numbers<[1], [0], [0], [1], [0, 0, 1, 1], [], []>} : vector<256x128xbf16>, vector<128x384xbf16>, vector<256x384xf32> -> vector<256x384xf32>
    %c0_3 = arith.constant 0 : index
    %c0_4 = arith.constant 0 : index
    %3 = vector.load %arg3[%c0_3, %c0_4] : memref<1x384xf32, #tpu.memory_space<vmem>>, vector<1x384xf32>
    %4 = vector.broadcast %3 : vector<1x384xf32> to vector<256x384xf32>
    %5 = arith.addf %2, %4 : vector<256x384xf32>
    %cst_5 = arith.constant 0.000000e+00 : f32
    %6 = vector.broadcast %cst_5 : f32 to vector<256x384xf32>
    %7 = arith.maximumf %5, %6 : vector<256x384xf32>
    %8 = vector.extract_strided_slice %7 {offsets = [0, 0], sizes = [256, 128], strides = [1, 1]} : vector<256x384xf32> to vector<256x128xf32>
    %9 = vector.extract_strided_slice %7 {offsets = [0, 128], sizes = [256, 128], strides = [1, 1]} : vector<256x384xf32> to vector<256x128xf32>
    %10 = arith.addf %8, %9 : vector<256x128xf32>
    %11 = vector.extract_strided_slice %7 {offsets = [0, 256], sizes = [256, 128], strides = [1, 1]} : vector<256x384xf32> to vector<256x128xf32>
    %12 = arith.addf %10, %11 : vector<256x128xf32>
    %cst_6 = arith.constant 0.333333343 : f32
    %13 = vector.broadcast %cst_6 : f32 to vector<256x128xf32>
    %14 = arith.mulf %12, %13 : vector<256x128xf32>
    %15 = arith.truncf %14 : vector<256x128xf32> to vector<256x128xbf16>
    %c0_7 = arith.constant 0 : index
    %c0_8 = arith.constant 0 : index
    %16 = vector.load %arg4[%c0_7, %c0_8] : memref<256x128xbf16, #tpu.memory_space<vmem>>, vector<256x128xbf16>
    tpu.vector_store %arg4[%c0_7, %c0_8], %15 {strides = array<i32>} : memref<256x128xbf16, #tpu.memory_space<vmem>>, vector<256x128xbf16>,
    return
  }
  func.func @transform_0(%arg0: i32) -> (i32, i32) {
    %c0_i32 = arith.constant 0 : i32
    %c0_i32_0 = arith.constant 0 : i32
    return %arg0, %c0_i32 : i32, i32
  }
  func.func @transform_1(%arg0: i32) -> (i32, i32) {
    %c0_i32 = arith.constant 0 : i32
    %c0_i32_0 = arith.constant 0 : i32
    %c0_i32_1 = arith.constant 0 : i32
    return %c0_i32, %c0_i32_0 : i32, i32
  }
  func.func @transform_2(%arg0: i32) -> (i32, i32) {
    %c0_i32 = arith.constant 0 : i32
    %c0_i32_0 = arith.constant 0 : i32
    %c0_i32_1 = arith.constant 0 : i32
    return %c0_i32, %c0_i32_0 : i32, i32
  }
  func.func @transform_3(%arg0: i32) -> (i32, i32) {
    %c0_i32 = arith.constant 0 : i32
    %c0_i32_0 = arith.constant 0 : i32
    return %arg0, %c0_i32 : i32, i32
  }
}

module attributes {stable_mosaic.version = 11 : i64} {
  func.func @_propagate_kernel(%arg0: i32, %arg1: i32, %arg2: memref<256x256xbf16, #tpu.memory_space<vmem>>, %arg3: memref<256x128xbf16, #tpu.memory_space<vmem>>, %arg4: memref<256x128xbf16, #tpu.memory_space<vmem>>, %arg5: memref<256x128xf32, #tpu.memory_space<vmem>>) attributes {dimension_semantics = [#tpu.dimension_semantics<parallel>, #tpu.dimension_semantics<arbitrary>], iteration_bounds = array<i64: 1, 1>, scalar_prefetch = 0 : i64, scratch_operands = 1 : i64, tpu.core_type = #tpu.core_type<tc>, window_params = [{transform_indices = @transform_0, window_bounds = array<i64: 256, 256>}, {transform_indices = @transform_1, window_bounds = array<i64: 256, 128>}, {transform_indices = @transform_2, window_bounds = array<i64: 256, 128>}]} {
    %c0_i32 = arith.constant 0 : i32
    %0 = arith.cmpi eq, %arg1, %c0_i32 : i32
    %1 = arith.extui %0 : i1 to i32
    %c0_i32_0 = arith.constant 0 : i32
    %2 = arith.cmpi ne, %1, %c0_i32_0 : i32
    scf.if %2 {
      %cst_10 = arith.constant 0.000000e+00 : f32
      %12 = vector.broadcast %cst_10 : f32 to vector<256x128xf32>
      %c0_11 = arith.constant 0 : index
      %c0_12 = arith.constant 0 : index
      %13 = vector.load %arg5[%c0_11, %c0_12] : memref<256x128xf32, #tpu.memory_space<vmem>>, vector<256x128xf32>
      tpu.vector_store %arg5[%c0_11, %c0_12], %12 {strides = array<i32>} : memref<256x128xf32, #tpu.memory_space<vmem>>, vector<256x128xf32>,
    } else {
    }
    %c0 = arith.constant 0 : index
    %c0_1 = arith.constant 0 : index
    %3 = vector.load %arg5[%c0, %c0_1] : memref<256x128xf32, #tpu.memory_space<vmem>>, vector<256x128xf32>
    %c0_2 = arith.constant 0 : index
    %c0_3 = arith.constant 0 : index
    %4 = vector.load %arg2[%c0_2, %c0_3] : memref<256x256xbf16, #tpu.memory_space<vmem>>, vector<256x256xbf16>
    %c0_4 = arith.constant 0 : index
    %c0_5 = arith.constant 0 : index
    %5 = vector.load %arg3[%c0_4, %c0_5] : memref<256x128xbf16, #tpu.memory_space<vmem>>, vector<256x128xbf16>
    %cst = arith.constant dense<0.000000e+00> : vector<256x128xf32>
    %6 = tpu.matmul %4, %5, %cst {dimension_numbers = #tpu.dot_dimension_numbers<[1], [0], [0], [1], [0, 0, 1, 1], [], []>} : vector<256x256xbf16>, vector<256x128xbf16>, vector<256x128xf32> -> vector<256x128xf32>
    %7 = arith.addf %3, %6 : vector<256x128xf32>
    %c0_6 = arith.constant 0 : index
    %c0_7 = arith.constant 0 : index
    %8 = vector.load %arg5[%c0_6, %c0_7] : memref<256x128xf32, #tpu.memory_space<vmem>>, vector<256x128xf32>
    tpu.vector_store %arg5[%c0_6, %c0_7], %7 {strides = array<i32>} : memref<256x128xf32, #tpu.memory_space<vmem>>, vector<256x128xf32>,
    %c0_i32_8 = arith.constant 0 : i32
    %9 = arith.cmpi eq, %arg1, %c0_i32_8 : i32
    %10 = arith.extui %9 : i1 to i32
    %c0_i32_9 = arith.constant 0 : i32
    %11 = arith.cmpi ne, %10, %c0_i32_9 : i32
    scf.if %11 {
      %c0_10 = arith.constant 0 : index
      %c0_11 = arith.constant 0 : index
      %12 = vector.load %arg5[%c0_10, %c0_11] : memref<256x128xf32, #tpu.memory_space<vmem>>, vector<256x128xf32>
      %13 = arith.truncf %12 : vector<256x128xf32> to vector<256x128xbf16>
      %c0_12 = arith.constant 0 : index
      %c0_13 = arith.constant 0 : index
      %14 = vector.load %arg4[%c0_12, %c0_13] : memref<256x128xbf16, #tpu.memory_space<vmem>>, vector<256x128xbf16>
      tpu.vector_store %arg4[%c0_12, %c0_13], %13 {strides = array<i32>} : memref<256x128xbf16, #tpu.memory_space<vmem>>, vector<256x128xbf16>,
    } else {
    }
    return
  }
  func.func @transform_0(%arg0: i32, %arg1: i32) -> (i32, i32) {
    %c0_i32 = arith.constant 0 : i32
    return %arg0, %arg1 : i32, i32
  }
  func.func @transform_1(%arg0: i32, %arg1: i32) -> (i32, i32) {
    %c0_i32 = arith.constant 0 : i32
    %c0_i32_0 = arith.constant 0 : i32
    return %arg1, %c0_i32 : i32, i32
  }
  func.func @transform_2(%arg0: i32, %arg1: i32) -> (i32, i32) {
    %c0_i32 = arith.constant 0 : i32
    %c0_i32_0 = arith.constant 0 : i32
    return %arg0, %c0_i32 : i32, i32
  }
}

module attributes {stable_mosaic.version = 11 : i64} {
  func.func @_propagate_classify_kernel(%arg0: i32, %arg1: i32, %arg2: memref<256x256xbf16, #tpu.memory_space<vmem>>, %arg3: memref<256x128xbf16, #tpu.memory_space<vmem>>, %arg4: memref<128x128xbf16, #tpu.memory_space<vmem>>, %arg5: memref<1x128xf32, #tpu.memory_space<vmem>>, %arg6: memref<256x128xf32, #tpu.memory_space<vmem>>, %arg7: memref<256x128xf32, #tpu.memory_space<vmem>>) attributes {dimension_semantics = [#tpu.dimension_semantics<parallel>, #tpu.dimension_semantics<arbitrary>], iteration_bounds = array<i64: 1, 1>, scalar_prefetch = 0 : i64, scratch_operands = 1 : i64, tpu.core_type = #tpu.core_type<tc>, window_params = [{transform_indices = @transform_0, window_bounds = array<i64: 256, 256>}, {transform_indices = @transform_1, window_bounds = array<i64: 256, 128>}, {pipeline_mode = #tpu.pipeline_mode<synchronous>, transform_indices = @transform_2, window_bounds = array<i64: 128, 128>}, {pipeline_mode = #tpu.pipeline_mode<synchronous>, transform_indices = @transform_3, window_bounds = array<i64: 1, 128>}, {transform_indices = @transform_4, window_bounds = array<i64: 256, 128>}]} {
    %c0_i32 = arith.constant 0 : i32
    %0 = arith.cmpi eq, %arg1, %c0_i32 : i32
    %1 = arith.extui %0 : i1 to i32
    %c0_i32_0 = arith.constant 0 : i32
    %2 = arith.cmpi ne, %1, %c0_i32_0 : i32
    scf.if %2 {
      %cst_10 = arith.constant 0.000000e+00 : f32
      %12 = vector.broadcast %cst_10 : f32 to vector<256x128xf32>
      %c0_11 = arith.constant 0 : index
      %c0_12 = arith.constant 0 : index
      %13 = vector.load %arg7[%c0_11, %c0_12] : memref<256x128xf32, #tpu.memory_space<vmem>>, vector<256x128xf32>
      tpu.vector_store %arg7[%c0_11, %c0_12], %12 {strides = array<i32>} : memref<256x128xf32, #tpu.memory_space<vmem>>, vector<256x128xf32>,
    } else {
    }
    %c0 = arith.constant 0 : index
    %c0_1 = arith.constant 0 : index
    %3 = vector.load %arg7[%c0, %c0_1] : memref<256x128xf32, #tpu.memory_space<vmem>>, vector<256x128xf32>
    %c0_2 = arith.constant 0 : index
    %c0_3 = arith.constant 0 : index
    %4 = vector.load %arg2[%c0_2, %c0_3] : memref<256x256xbf16, #tpu.memory_space<vmem>>, vector<256x256xbf16>
    %c0_4 = arith.constant 0 : index
    %c0_5 = arith.constant 0 : index
    %5 = vector.load %arg3[%c0_4, %c0_5] : memref<256x128xbf16, #tpu.memory_space<vmem>>, vector<256x128xbf16>
    %cst = arith.constant dense<0.000000e+00> : vector<256x128xf32>
    %6 = tpu.matmul %4, %5, %cst {dimension_numbers = #tpu.dot_dimension_numbers<[1], [0], [0], [1], [0, 0, 1, 1], [], []>} : vector<256x256xbf16>, vector<256x128xbf16>, vector<256x128xf32> -> vector<256x128xf32>
    %7 = arith.addf %3, %6 : vector<256x128xf32>
    %c0_6 = arith.constant 0 : index
    %c0_7 = arith.constant 0 : index
    %8 = vector.load %arg7[%c0_6, %c0_7] : memref<256x128xf32, #tpu.memory_space<vmem>>, vector<256x128xf32>
    tpu.vector_store %arg7[%c0_6, %c0_7], %7 {strides = array<i32>} : memref<256x128xf32, #tpu.memory_space<vmem>>, vector<256x128xf32>,
    %c0_i32_8 = arith.constant 0 : i32
    %9 = arith.cmpi eq, %arg1, %c0_i32_8 : i32
    %10 = arith.extui %9 : i1 to i32
    %c0_i32_9 = arith.constant 0 : i32
    %11 = arith.cmpi ne, %10, %c0_i32_9 : i32
    scf.if %11 {
      %c0_10 = arith.constant 0 : index
      %c0_11 = arith.constant 0 : index
      %12 = vector.load %arg7[%c0_10, %c0_11] : memref<256x128xf32, #tpu.memory_space<vmem>>, vector<256x128xf32>
      %13 = arith.truncf %12 : vector<256x128xf32> to vector<256x128xbf16>
      %c0_12 = arith.constant 0 : index
      %c0_13 = arith.constant 0 : index
      %14 = vector.load %arg4[%c0_12, %c0_13] : memref<128x128xbf16, #tpu.memory_space<vmem>>, vector<128x128xbf16>
      %cst_14 = arith.constant dense<0.000000e+00> : vector<256x128xf32>
      %15 = tpu.matmul %13, %14, %cst_14 {dimension_numbers = #tpu.dot_dimension_numbers<[1], [0], [0], [1], [0, 0, 1, 1], [], []>} : vector<256x128xbf16>, vector<128x128xbf16>, vector<256x128xf32> -> vector<256x128xf32>
      %c0_15 = arith.constant 0 : index
      %c0_16 = arith.constant 0 : index
      %16 = vector.load %arg5[%c0_15, %c0_16] : memref<1x128xf32, #tpu.memory_space<vmem>>, vector<1x128xf32>
      %17 = vector.broadcast %16 : vector<1x128xf32> to vector<256x128xf32>
      %18 = arith.addf %15, %17 : vector<256x128xf32>
      %19 = tpu.iota {dimensions = array<i32: 1>} : vector<256x128xi32>
      %c4_i32 = arith.constant 4 : i32
      %20 = vector.broadcast %c4_i32 : i32 to vector<256x128xi32>
      %21 = arith.cmpi slt, %19, %20 : vector<256x128xi32>
      %cst_17 = arith.constant -1.000000e+30 : f32
      %22 = vector.broadcast %cst_17 : f32 to vector<256x128xf32>
      %23 = arith.select %21, %18, %22 : vector<256x128xi1>, vector<256x128xf32>
      %cst_18 = arith.constant dense<0xFF800000> : vector<256xf32>
      %24 = vector.multi_reduction <maximumf>, %23, %cst_18 [1] : vector<256x128xf32> to vector<256xf32>
      %25 = vector.shape_cast %24 : vector<256xf32> to vector<256x1xf32>
      %26 = vector.broadcast %25 : vector<256x1xf32> to vector<256x128xf32>
      %27 = arith.subf %23, %26 : vector<256x128xf32>
      %28 = math.exp %27 : vector<256x128xf32>
      %cst_19 = arith.constant dense<0.000000e+00> : vector<256xf32>
      %29 = vector.multi_reduction <add>, %28, %cst_19 [1] : vector<256x128xf32> to vector<256xf32>
      %30 = vector.shape_cast %29 : vector<256xf32> to vector<256x1xf32>
      %31 = math.log %30 : vector<256x1xf32>
      %32 = vector.broadcast %31 : vector<256x1xf32> to vector<256x128xf32>
      %33 = arith.subf %27, %32 : vector<256x128xf32>
      %c0_20 = arith.constant 0 : index
      %c0_21 = arith.constant 0 : index
      %34 = vector.load %arg6[%c0_20, %c0_21] : memref<256x128xf32, #tpu.memory_space<vmem>>, vector<256x128xf32>
      tpu.vector_store %arg6[%c0_20, %c0_21], %33 {strides = array<i32>} : memref<256x128xf32, #tpu.memory_space<vmem>>, vector<256x128xf32>,
    } else {
    }
    return
  }
  func.func @transform_0(%arg0: i32, %arg1: i32) -> (i32, i32) {
    %c0_i32 = arith.constant 0 : i32
    return %arg0, %arg1 : i32, i32
  }
  func.func @transform_1(%arg0: i32, %arg1: i32) -> (i32, i32) {
    %c0_i32 = arith.constant 0 : i32
    %c0_i32_0 = arith.constant 0 : i32
    return %arg1, %c0_i32 : i32, i32
  }
  func.func @transform_2(%arg0: i32, %arg1: i32) -> (i32, i32) {
    %c0_i32 = arith.constant 0 : i32
    %c0_i32_0 = arith.constant 0 : i32
    %c0_i32_1 = arith.constant 0 : i32
    return %c0_i32, %c0_i32_0 : i32, i32
  }
  func.func @transform_3(%arg0: i32, %arg1: i32) -> (i32, i32) {
    %c0_i32 = arith.constant 0 : i32
    %c0_i32_0 = arith.constant 0 : i32
    %c0_i32_1 = arith.constant 0 : i32
    return %c0_i32, %c0_i32_0 : i32, i32
  }
  func.func @transform_4(%arg0: i32, %arg1: i32) -> (i32, i32) {
    %c0_i32 = arith.constant 0 : i32
    %c0_i32_0 = arith.constant 0 : i32
    return %arg0, %c0_i32 : i32, i32
  }
}

</mosaic_0001>

<bundles_post_ra>
// kernel: afgcn_forward.4
= control target key start
LH: loop header
LB: loop body
LE: loop exit
PB: predicated region body
PF: predicated region fallthrough
CT: control target
= control target key end

     0   :  { %s1430_s1 = inlined_call_operand.vmem [shape: bf16[256,128], index: 1, kind: input, shape index: {}]   ;;  %s1431_s0 = inlined_call_operand.vmem [shape: bf16[256,256], index: 0, kind: input, shape index: {}]   ;;  %s1432_s2 = inlined_call_operand.vmem [shape: bf16[256,128], index: 2, kind: output, shape index: {}]  }
   0x1   :  { %v1159_v0 = vld [vmem:[%s1430_s1 + $0x40] sm:$0xff]   ;;  %v1161_v2 = vld [vmem:[%s1430_s1 + $0x48] sm:$0xff]   ;;  %v1163_v4 = vld [vmem:[%s1430_s1 + $0x50] sm:$0xff]  }
   0x2   :  { %v1160_v1 = vld [vmem:[%s1430_s1] sm:$0xff]   ;;  %1031 = vmatprep.subr.bf16.mxu0 %v1159_v0  ;;  %1143 = vmatprep.subr.bf16.mxu1 %v1159_v0  ;;  %v1162_v3 = vld [vmem:[%s1430_s1 + $0x8] sm:$0xff]   ;;  %v1164_v5 = vld [vmem:[%s1430_s1 + $0x10] sm:$0xff]  }
   0x3   :  { %1032 = vmatpush3.bf16.msra.mxu0 %v1160_v1  ;;  %1151 = vmatpush3.bf16.msra.mxu1 %v1160_v1  ;;  %v1165_v6 = vld [vmem:[%s1430_s1 + $0x58] sm:$0xff]   ;;  %v1167_v8 = vld [vmem:[%s1430_s1 + $0x60] sm:$0xff]   ;;  %v1169_v10 = vld [vmem:[%s1430_s1 + $0x68] sm:$0xff]  }
   0x4   :  { %1033 = vmatprep.subr.bf16.mxu0 %v1161_v2  ;;  %1144 = vmatprep.subr.bf16.mxu1 %v1161_v2  ;;  %v1166_v7 = vld [vmem:[%s1430_s1 + $0x18] sm:$0xff]   ;;  %v1168_v9 = vld [vmem:[%s1430_s1 + $0x20] sm:$0xff]   ;;  %v1170_v13 = vld [vmem:[%s1430_s1 + $0x28] sm:$0xff]  }
   0x5   :  { %v1177_v11 = vld [vmem:[%s1431_s0 + $0x4] ss:$8 sps:$4 sm:$0xff]   ;;  %v1171_v14 = vld [vmem:[%s1430_s1 + $0x70] sm:$0xff]   ;;  %v1173_v16 = vld [vmem:[%s1430_s1 + $0x78] sm:$0xff]  }
   0x6   :  { %v1180_v12 = vld [vmem:[%s1431_s0 + $0x84] ss:$8 sps:$4 sm:$0xff]   ;;  %432 = vmatprep.mubr.bf16.mxu0 %v1177_v11  ;;  %v1172_v15 = vld [vmem:[%s1430_s1 + $0x30] sm:$0xff]   ;;  %v1174_v17 = vld [vmem:[%s1430_s1 + $0x38] sm:$0xff]  }
   0x7   :  { %1034 = vmatpush3.bf16.msra.mxu0 %v1162_v3  ;;  %1152 = vmatpush3.bf16.msra.mxu1 %v1162_v3  ;;  %v1175_v18 = vld [vmem:[%s1431_s0] ss:$8 sps:$4 sm:$0xff]   ;;  %v1181_v20 = vld [vmem:[%s1431_s0 + $0x14] ss:$8 sps:$4 sm:$0xff]   ;;  %v1185_v22 = vld [vmem:[%s1431_s0 + $0x10] ss:$8 sps:$4 sm:$0xff]  }
   0x8   :  { %1035 = vmatprep.subr.bf16.mxu0 %v1163_v4  ;;  %1145 = vmatprep.subr.bf16.mxu1 %v1163_v4  ;;  %v1178_v19 = vld [vmem:[%s1431_s0 + $0x80] ss:$8 sps:$4 sm:$0xff]   ;;  %v1183_v21 = vld [vmem:[%s1431_s0 + $0x94] ss:$8 sps:$4 sm:$0xff]   ;;  %v1186_v23 = vld [vmem:[%s1431_s0 + $0x90] ss:$8 sps:$4 sm:$0xff]  }
   0x9   :  { %496 = vmatprep.mubr.bf16.mxu1 %v1180_v12  ;;  %v1187_v24 = vld [vmem:[%s1431_s0 + $0x24] ss:$8 sps:$4 sm:$0xff]   ;;  %v1191_v26 = vld [vmem:[%s1431_s0 + $0x20] ss:$8 sps:$4 sm:$0xff]   ;;  %v1193_v28 = vld [vmem:[%s1431_s0 + $0x34] ss:$8 sps:$4 sm:$0xff]  }
   0xa   :  { %v1189_v25 = vld [vmem:[%s1431_s0 + $0xa4] ss:$8 sps:$4 sm:$0xff]   ;;  %v1192_v27 = vld [vmem:[%s1431_s0 + $0xa0] ss:$8 sps:$4 sm:$0xff]   ;;  %v1195_v29 = vld [vmem:[%s1431_s0 + $0xb4] ss:$8 sps:$4 sm:$0xff]  }
   0xb   :  { %1036 = vmatpush3.bf16.msra.mxu0 %v1164_v5  ;;  %1153 = vmatpush3.bf16.msra.mxu1 %v1164_v5  ;;  %v1197_v30 = vld [vmem:[%s1431_s0 + $0x30] ss:$8 sps:$4 sm:$0xff]   ;;  %v1199_v32 = vld [vmem:[%s1431_s0 + $0x44] ss:$8 sps:$4 sm:$0xff]   ;;  %v1203_v34 = vld [vmem:[%s1431_s0 + $0x40] ss:$8 sps:$4 sm:$0xff]  }
   0xc   :  { %1037 = vmatprep.subr.bf16.mxu0 %v1165_v6  ;;  %1146 = vmatprep.subr.bf16.mxu1 %v1165_v6  ;;  %v1198_v31 = vld [vmem:[%s1431_s0 + $0xb0] ss:$8 sps:$4 sm:$0xff]   ;;  %v1201_v33 = vld [vmem:[%s1431_s0 + $0xc4] ss:$8 sps:$4 sm:$0xff]   ;;  %v1204_v35 = vld [vmem:[%s1431_s0 + $0xc0] ss:$8 sps:$4 sm:$0xff]  }
   0xd   :  { %v1205_v36 = vld [vmem:[%s1431_s0 + $0x54] ss:$8 sps:$4 sm:$0xff]   ;;  %v1209_v38 = vld [vmem:[%s1431_s0 + $0x50] ss:$8 sps:$4 sm:$0xff]   ;;  %v1211_v40 = vld [vmem:[%s1431_s0 + $0x64] ss:$8 sps:$4 sm:$0xff]  }
   0xe   :  { %v1207_v37 = vld [vmem:[%s1431_s0 + $0xd4] ss:$8 sps:$4 sm:$0xff]   ;;  %v1210_v39 = vld [vmem:[%s1431_s0 + $0xd0] ss:$8 sps:$4 sm:$0xff]   ;;  %v1213_v41 = vld [vmem:[%s1431_s0 + $0xe4] ss:$8 sps:$4 sm:$0xff]  }
   0xf   :  { %1038 = vmatpush3.bf16.msra.mxu0 %v1166_v7  ;;  %1154 = vmatpush3.bf16.msra.mxu1 %v1166_v7  ;;  %v1215_v42 = vld [vmem:[%s1431_s0 + $0x60] ss:$8 sps:$4 sm:$0xff]   ;;  %v1217_v44 = vld [vmem:[%s1431_s0 + $0x74] ss:$8 sps:$4 sm:$0xff]   ;;  %v1221_v46 = vld [vmem:[%s1431_s0 + $0x70] ss:$8 sps:$4 sm:$0xff]  }
  0x10   :  { %1039 = vmatprep.subr.bf16.mxu0 %v1167_v8  ;;  %1147 = vmatprep.subr.bf16.mxu1 %v1167_v8  ;;  %v1216_v43 = vld [vmem:[%s1431_s0 + $0xe0] ss:$8 sps:$4 sm:$0xff]   ;;  %v1219_v45 = vld [vmem:[%s1431_s0 + $0xf4] ss:$8 sps:$4 sm:$0xff]   ;;  %v1222_v47 = vld [vmem:[%s1431_s0 + $0xf0] ss:$8 sps:$4 sm:$0xff]  }
  0x13   :  { %1040 = vmatpush3.bf16.msra.mxu0 %v1168_v9  ;;  %1155 = vmatpush3.bf16.msra.mxu1 %v1168_v9 }
  0x14   :  { %1041 = vmatprep.subr.bf16.mxu0 %v1169_v10  ;;  %1148 = vmatprep.subr.bf16.mxu1 %v1169_v10 }
  0x17   :  { %1042 = vmatpush3.bf16.msra.mxu0 %v1170_v13  ;;  %1156 = vmatpush3.bf16.msra.mxu1 %v1170_v13 }
  0x18   :  { %1043 = vmatprep.subr.bf16.mxu0 %v1171_v14  ;;  %1149 = vmatprep.subr.bf16.mxu1 %v1171_v14 }
  0x1b   :  { %1044 = vmatpush3.bf16.msra.mxu0 %v1172_v15  ;;  %1157 = vmatpush3.bf16.msra.mxu1 %v1172_v15 }
  0x1c   :  { %1045 = vmatprep.subr.bf16.mxu0 %v1173_v16  ;;  %1150 = vmatprep.subr.bf16.mxu1 %v1173_v16 }
  0x1f   :  { %1046 = vmatpush3.bf16.msra.mxu0 %v1174_v17  ;;  %1158 = vmatpush3.bf16.msra.mxu1 %v1174_v17 }
  0x22   :  { %433 = vmatmul.mubr.bf16.vlgmr.msra.gmra.mrb[0].mxu0 %v1175_v18  ;;  %497 = vmatmul.mubr.bf16.vlgmr.msra.gmra.mrb[0].mxu1 %v1178_v19 }
  0x23   :  { %440 = vmatprep.mubr.bf16.mxu0 %v1181_v20  ;;  %504 = vmatprep.mubr.bf16.mxu1 %v1183_v21 }
  0x2a   :  { %441 = vmatmul.mubr.bf16.gmra.mrb[4].mxu0 %v1185_v22  ;;  %505 = vmatmul.mubr.bf16.gmra.mrb[4].mxu1 %v1186_v23 }
  0x2b   :  { %448 = vmatprep.mubr.bf16.mxu0 %v1187_v24  ;;  %512 = vmatprep.mubr.bf16.mxu1 %v1189_v25 }
  0x32   :  { %449 = vmatmul.mubr.bf16.gmra.mrb[8].mxu0 %v1191_v26  ;;  %513 = vmatmul.mubr.bf16.gmra.mrb[8].mxu1 %v1192_v27 }
  0x33   :  { %456 = vmatprep.mubr.bf16.mxu0 %v1193_v28  ;;  %520 = vmatprep.mubr.bf16.mxu1 %v1195_v29 }
  0x3a   :  { %457 = vmatmul.mubr.bf16.gmra.mrb[12].mxu0 %v1197_v30  ;;  %521 = vmatmul.mubr.bf16.gmra.mrb[12].mxu1 %v1198_v31 }
  0x3b   :  { %464 = vmatprep.mubr.bf16.mxu0 %v1199_v32  ;;  %528 = vmatprep.mubr.bf16.mxu1 %v1201_v33 }
  0x42   :  { %465 = vmatmul.mubr.bf16.gmra.mrb[16].mxu0 %v1203_v34  ;;  %529 = vmatmul.mubr.bf16.gmra.mrb[16].mxu1 %v1204_v35 }
  0x43   :  { %472 = vmatprep.mubr.bf16.mxu0 %v1205_v36  ;;  %536 = vmatprep.mubr.bf16.mxu1 %v1207_v37 }
  0x4a   :  { %473 = vmatmul.mubr.bf16.gmra.mrb[20].mxu0 %v1209_v38  ;;  %537 = vmatmul.mubr.bf16.gmra.mrb[20].mxu1 %v1210_v39 }
  0x4b   :  { %480 = vmatprep.mubr.bf16.mxu0 %v1211_v40  ;;  %544 = vmatprep.mubr.bf16.mxu1 %v1213_v41 }
  0x52   :  { %481 = vmatmul.mubr.bf16.gmra.mrb[24].mxu0 %v1215_v42  ;;  %545 = vmatmul.mubr.bf16.gmra.mrb[24].mxu1 %v1216_v43 }
  0x53   :  { %488 = vmatprep.mubr.bf16.mxu0 %v1217_v44  ;;  %552 = vmatprep.mubr.bf16.mxu1 %v1219_v45 }
  0x5a   :  { %489 = vmatmul.mubr.bf16.gmra.mrb[28].mxu0 %v1221_v46  ;;  %553 = vmatmul.mubr.bf16.gmra.mrb[28].mxu1 %v1222_v47 }
  0xf5   :  { %v1047_v48 = vpop.f32.mrb[0].mxu0  ;;  %v1095_v49 = vpop.f32.mrb[0].mxu1 }
  0xf6   :  { %v1048_v50 = vpop.f32.mrb[1].mxu0  ;;  %v1096_v51 = vpop.f32.mrb[1].mxu1 }
  0xf7   :  { %v1049_v52 = vadd.f32 %v1048_v50, %v1047_v48  ;;  %v1097_v53 = vadd.f32 %v1096_v51, %v1095_v49  ;;  %v1050_v54 = vpop.f32.mrb[2].mxu0  ;;  %v1098_v55 = vpop.f32.mrb[2].mxu1 }
  0xf8   :  { %v1051_v56 = vpop.f32.mrb[3].mxu0  ;;  %v1099_v57 = vpop.f32.mrb[3].mxu1 }
  0xf9   :  { %v1052_v58 = vadd.f32 %v1051_v56, %v1050_v54  ;;  %v1100_v59 = vadd.f32 %v1099_v57, %v1098_v55 }
  0xfb   :  { %v939_v60 = vpack.c.bf16 %v1052_v58, %v1049_v52  ;;  %v979_v61 = vpack.c.bf16 %v1100_v59, %v1097_v53 }
  0xfd   :  { %940 = vst [vmem:[%s1432_s2] sm:$0xff] %v939_v60   ;;  %1023 = vst [vmem:[%s1432_s2 + $0x40] sm:$0xff] %v979_v61   ;;  %v1053_v62 = vpop.f32.mrb[4].mxu0  ;;  %v1101_v63 = vpop.f32.mrb[4].mxu1 }
  0xfe   :  { %v1054_v0 = vpop.f32.mrb[5].mxu0  ;;  %v1102_v1 = vpop.f32.mrb[5].mxu1 }
  0xff   :  { %v1055_v2 = vadd.f32 %v1054_v0, %v1053_v62  ;;  %v1103_v3 = vadd.f32 %v1102_v1, %v1101_v63  ;;  %v1056_v4 = vpop.f32.mrb[6].mxu0  ;;  %v1104_v5 = vpop.f32.mrb[6].mxu1 }
 0x100   :  { %v1057_v6 = vpop.f32.mrb[7].mxu0  ;;  %v1105_v7 = vpop.f32.mrb[7].mxu1 }
 0x101   :  { %v1058_v8 = vadd.f32 %v1057_v6, %v1056_v4  ;;  %v1106_v9 = vadd.f32 %v1105_v7, %v1104_v5 }
 0x103   :  { %v944_v10 = vpack.c.bf16 %v1058_v8, %v1055_v2  ;;  %v984_v11 = vpack.c.bf16 %v1106_v9, %v1103_v3 }
 0x105   :  { %1016 = vst [vmem:[%s1432_s2 + $0x8] sm:$0xff] %v944_v10   ;;  %1024 = vst [vmem:[%s1432_s2 + $0x48] sm:$0xff] %v984_v11   ;;  %v1059_v12 = vpop.f32.mrb[8].mxu0  ;;  %v1107_v13 = vpop.f32.mrb[8].mxu1 }
 0x106   :  { %v1060_v14 = vpop.f32.mrb[9].mxu0  ;;  %v1108_v15 = vpop.f32.mrb[9].mxu1 }
 0x107   :  { %v1061_v16 = vadd.f32 %v1060_v14, %v1059_v12  ;;  %v1109_v17 = vadd.f32 %v1108_v15, %v1107_v13  ;;  %v1062_v18 = vpop.f32.mrb[10].mxu0  ;;  %v1110_v19 = vpop.f32.mrb[10].mxu1 }
 0x108   :  { %v1063_v20 = vpop.f32.mrb[11].mxu0  ;;  %v1111_v21 = vpop.f32.mrb[11].mxu1 }
 0x109   :  { %v1064_v22 = vadd.f32 %v1063_v20, %v1062_v18  ;;  %v1112_v23 = vadd.f32 %v1111_v21, %v1110_v19 }
 0x10b   :  { %v949_v24 = vpack.c.bf16 %v1064_v22, %v1061_v16  ;;  %v989_v25 = vpack.c.bf16 %v1112_v23, %v1109_v17 }
 0x10d   :  { %1017 = vst [vmem:[%s1432_s2 + $0x10] sm:$0xff] %v949_v24   ;;  %1025 = vst [vmem:[%s1432_s2 + $0x50] sm:$0xff] %v989_v25   ;;  %v1065_v26 = vpop.f32.mrb[12].mxu0  ;;  %v1113_v27 = vpop.f32.mrb[12].mxu1 }
 0x10e   :  { %v1066_v28 = vpop.f32.mrb[13].mxu0  ;;  %v1114_v29 = vpop.f32.mrb[13].mxu1 }
 0x10f   :  { %v1067_v30 = vadd.f32 %v1066_v28, %v1065_v26  ;;  %v1115_v31 = vadd.f32 %v1114_v29, %v1113_v27  ;;  %v1068_v32 = vpop.f32.mrb[14].mxu0  ;;  %v1116_v33 = vpop.f32.mrb[14].mxu1 }
 0x110   :  { %v1069_v34 = vpop.f32.mrb[15].mxu0  ;;  %v1117_v35 = vpop.f32.mrb[15].mxu1 }
 0x111   :  { %v1070_v36 = vadd.f32 %v1069_v34, %v1068_v32  ;;  %v1118_v37 = vadd.f32 %v1117_v35, %v1116_v33 }
 0x113   :  { %v954_v38 = vpack.c.bf16 %v1070_v36, %v1067_v30  ;;  %v994_v39 = vpack.c.bf16 %v1118_v37, %v1115_v31 }
 0x115   :  { %1018 = vst [vmem:[%s1432_s2 + $0x18] sm:$0xff] %v954_v38   ;;  %1026 = vst [vmem:[%s1432_s2 + $0x58] sm:$0xff] %v994_v39   ;;  %v1071_v40 = vpop.f32.mrb[16].mxu0  ;;  %v1119_v41 = vpop.f32.mrb[16].mxu1 }
 0x116   :  { %v1072_v42 = vpop.f32.mrb[17].mxu0  ;;  %v1120_v43 = vpop.f32.mrb[17].mxu1 }
 0x117   :  { %v1073_v44 = vadd.f32 %v1072_v42, %v1071_v40  ;;  %v1121_v45 = vadd.f32 %v1120_v43, %v1119_v41  ;;  %v1074_v46 = vpop.f32.mrb[18].mxu0  ;;  %v1122_v47 = vpop.f32.mrb[18].mxu1 }
 0x118   :  { %v1075_v48 = vpop.f32.mrb[19].mxu0  ;;  %v1123_v49 = vpop.f32.mrb[19].mxu1 }
 0x119   :  { %v1076_v50 = vadd.f32 %v1075_v48, %v1074_v46  ;;  %v1124_v51 = vadd.f32 %v1123_v49, %v1122_v47 }
 0x11b   :  { %v959_v52 = vpack.c.bf16 %v1076_v50, %v1073_v44  ;;  %v999_v53 = vpack.c.bf16 %v1124_v51, %v1121_v45 }
 0x11d   :  { %1019 = vst [vmem:[%s1432_s2 + $0x20] sm:$0xff] %v959_v52   ;;  %1027 = vst [vmem:[%s1432_s2 + $0x60] sm:$0xff] %v999_v53   ;;  %v1077_v54 = vpop.f32.mrb[20].mxu0  ;;  %v1125_v55 = vpop.f32.mrb[20].mxu1 }
 0x11e   :  { %v1078_v56 = vpop.f32.mrb[21].mxu0  ;;  %v1126_v57 = vpop.f32.mrb[21].mxu1 }
 0x11f   :  { %v1079_v58 = vadd.f32 %v1078_v56, %v1077_v54  ;;  %v1127_v59 = vadd.f32 %v1126_v57, %v1125_v55  ;;  %v1080_v60 = vpop.f32.mrb[22].mxu0  ;;  %v1128_v61 = vpop.f32.mrb[22].mxu1 }
 0x120   :  { %v1081_v62 = vpop.f32.mrb[23].mxu0  ;;  %v1129_v63 = vpop.f32.mrb[23].mxu1 }
 0x121   :  { %v1082_v0 = vadd.f32 %v1081_v62, %v1080_v60  ;;  %v1130_v1 = vadd.f32 %v1129_v63, %v1128_v61 }
 0x123   :  { %v964_v2 = vpack.c.bf16 %v1082_v0, %v1079_v58  ;;  %v1004_v3 = vpack.c.bf16 %v1130_v1, %v1127_v59 }
 0x125   :  { %1020 = vst [vmem:[%s1432_s2 + $0x28] sm:$0xff] %v964_v2   ;;  %1028 = vst [vmem:[%s1432_s2 + $0x68] sm:$0xff] %v1004_v3   ;;  %v1083_v4 = vpop.f32.mrb[24].mxu0  ;;  %v1131_v5 = vpop.f32.mrb[24].mxu1 }
 0x126   :  { %v1084_v6 = vpop.f32.mrb[25].mxu0  ;;  %v1132_v7 = vpop.f32.mrb[25].mxu1 }
 0x127   :  { %v1085_v8 = vadd.f32 %v1084_v6, %v1083_v4  ;;  %v1133_v9 = vadd.f32 %v1132_v7, %v1131_v5  ;;  %v1086_v10 = vpop.f32.mrb[26].mxu0  ;;  %v1134_v11 = vpop.f32.mrb[26].mxu1 }
 0x128   :  { %v1087_v12 = vpop.f32.mrb[27].mxu0  ;;  %v1135_v13 = vpop.f32.mrb[27].mxu1 }
 0x129   :  { %v1088_v14 = vadd.f32 %v1087_v12, %v1086_v10  ;;  %v1136_v15 = vadd.f32 %v1135_v13, %v1134_v11 }
 0x12b   :  { %v969_v16 = vpack.c.bf16 %v1088_v14, %v1085_v8  ;;  %v1009_v17 = vpack.c.bf16 %v1136_v15, %v1133_v9 }
 0x12d   :  { %1021 = vst [vmem:[%s1432_s2 + $0x30] sm:$0xff] %v969_v16   ;;  %1029 = vst [vmem:[%s1432_s2 + $0x70] sm:$0xff] %v1009_v17   ;;  %v1089_v18 = vpop.f32.mrb[28].mxu0  ;;  %v1137_v19 = vpop.f32.mrb[28].mxu1 }
 0x12e   :  { %v1090_v20 = vpop.f32.mrb[29].mxu0  ;;  %v1138_v21 = vpop.f32.mrb[29].mxu1 }
 0x12f   :  { %v1091_v22 = vadd.f32 %v1090_v20, %v1089_v18  ;;  %v1139_v23 = vadd.f32 %v1138_v21, %v1137_v19  ;;  %v1092_v24 = vpop.f32.mrb[30].mxu0  ;;  %v1140_v25 = vpop.f32.mrb[30].mxu1 }
 0x130   :  { %v1093_v26 = vpop.f32.mrb[31].mxu0  ;;  %v1141_v27 = vpop.f32.mrb[31].mxu1 }
 0x131   :  { %v1094_v28 = vadd.f32 %v1093_v26, %v1092_v24  ;;  %v1142_v29 = vadd.f32 %v1141_v27, %v1140_v25 }
 0x133   :  { %v974_v30 = vpack.c.bf16 %v1094_v28, %v1091_v22  ;;  %v1014_v31 = vpack.c.bf16 %v1142_v29, %v1139_v23 }
 0x135   :  { %1022 = vst [vmem:[%s1432_s2 + $0x38] sm:$0xff] %v974_v30   ;;  %1030 = vst [vmem:[%s1432_s2 + $0x78] sm:$0xff] %v1014_v31  }

// kernel: afgcn_forward.3
= control target key start
LH: loop header
LB: loop body
LE: loop exit
PB: predicated region body
PF: predicated region fallthrough
CT: control target
= control target key end

     0   :  { %v1366_v1 = vmov 0   ;;  %v81_v41 = vlaneseq  ;;  %s1750_s1 = inlined_call_operand.vmem [shape: bf16[128,384], index: 1, kind: input, shape index: {}]   ;;  %s1751_s0 = inlined_call_operand.vmem [shape: bf16[256,128], index: 0, kind: input, shape index: {}]   ;;  %s1752_s2 = inlined_call_operand.vmem [shape: f32[1,384], index: 2, kind: input, shape index: {}]   ;;  %s1753_s3 = inlined_call_operand.vmem [shape: bf16[256,128], index: 3, kind: output, shape index: {}]  }
   0x1   :  { %v1318_v0 = vld [vmem:[%s1750_s1 + $0x4] ss:$12 sps:$4 sm:$0xff]   ;;  %352 = vmatprep.mubr.bf16.mxu0 %v1366_v1  ;;  %472 = vmatprep.mubr.bf16.mxu1 %v1366_v1  ;;  %v1320_v2 = vld [vmem:[%s1750_s1] ss:$12 sps:$4 sm:$0xff]   ;;  %v1321_v3 = vld [vmem:[%s1750_s1 + $0x1c] ss:$12 sps:$4 sm:$0xff]  }
   0x2   :  { %320 = vmatprep.subr.bf16.mxu0 %v1318_v0  ;;  %1301 = vmatprep.subr.bf16.mxu1 %v1318_v0  ;;  %v1323_v4 = vld [vmem:[%s1750_s1 + $0x18] ss:$12 sps:$4 sm:$0xff]   ;;  %v1324_v5 = vld [vmem:[%s1750_s1 + $0x34] ss:$12 sps:$4 sm:$0xff]   ;;  %v1326_v6 = vld [vmem:[%s1750_s1 + $0x30] ss:$12 sps:$4 sm:$0xff]  }
   0x3   :  { %321 = vmatpush1.bf16.msra.mxu0 %v1320_v2  ;;  %1309 = vmatpush1.bf16.msra.mxu1 %v1320_v2  ;;  %v1327_v7 = vld [vmem:[%s1750_s1 + $0x4c] ss:$12 sps:$4 sm:$0xff]   ;;  %v1329_v8 = vld [vmem:[%s1750_s1 + $0x48] ss:$12 sps:$4 sm:$0xff]   ;;  %v1330_v9 = vld [vmem:[%s1750_s1 + $0x64] ss:$12 sps:$4 sm:$0xff]  }
   0x4   :  { %322 = vmatprep.subr.bf16.mxu0 %v1321_v3  ;;  %1302 = vmatprep.subr.bf16.mxu1 %v1321_v3  ;;  %v1332_v10 = vld [vmem:[%s1750_s1 + $0x60] ss:$12 sps:$4 sm:$0xff]   ;;  %v1333_v11 = vld [vmem:[%s1750_s1 + $0x7c] ss:$12 sps:$4 sm:$0xff]   ;;  %v1335_v12 = vld [vmem:[%s1750_s1 + $0x78] ss:$12 sps:$4 sm:$0xff]  }
   0x5   :  { %v1336_v13 = vld [vmem:[%s1750_s1 + $0x94] ss:$12 sps:$4 sm:$0xff]   ;;  %v1338_v14 = vld [vmem:[%s1750_s1 + $0x90] ss:$12 sps:$4 sm:$0xff]   ;;  %v1339_v15 = vld [vmem:[%s1750_s1 + $0xac] ss:$12 sps:$4 sm:$0xff]  }
   0x6   :  { %v1341_v16 = vld [vmem:[%s1750_s1 + $0xa8] ss:$12 sps:$4 sm:$0xff]   ;;  %v1342_v18 = vld [vmem:[%s1751_s0] sm:$0xff]   ;;  %v1349_v24 = vld [vmem:[%s1750_s1 + $0x50] ss:$12 sps:$4 sm:$0xff]   ;;  %v1531_v42 = vshrl.u32 %v81_v41, 7 }
   0x7   :  { %323 = vmatpush1.bf16.msra.mxu0 %v1323_v4  ;;  %1310 = vmatpush1.bf16.msra.mxu1 %v1323_v4  ;;  %v1344_v17 = vld [vmem:[%s1750_s1 + $0x8] ss:$12 sps:$4 sm:$0xff]   ;;  %v1446_v19 = vld [vmem:[%s1751_s0 + $0x60] sm:$0xff]   ;;  %v1354_v30 = vld [vmem:[%s1751_s0 + $0x18] sm:$0xff]  }
   0x8   :  { %324 = vmatprep.subr.bf16.mxu0 %v1324_v5  ;;  %1303 = vmatprep.subr.bf16.mxu1 %v1324_v5  ;;  %v1345_v20 = vld [vmem:[%s1750_s1 + $0x20] ss:$12 sps:$4 sm:$0xff]   ;;  %v1348_v21 = vld [vmem:[%s1750_s1 + $0x38] ss:$12 sps:$4 sm:$0xff]   ;;  %v1352_v25 = vld [vmem:[%s1750_s1 + $0x68] ss:$12 sps:$4 sm:$0xff]  }
   0x9   :  { %v1346_v22 = vld [vmem:[%s1751_s0 + $0x8] sm:$0xff]   ;;  %v1350_v26 = vld [vmem:[%s1751_s0 + $0x10] sm:$0xff]   ;;  %v1356_v29 = vld [vmem:[%s1750_s1 + $0x98] ss:$12 sps:$4 sm:$0xff]   ;;  %v83_v43 = vsub.s32 0, %v1531_v42  ;;  %v87_v45 = vsub.s32 1, %v1531_v42 }
   0xa   :  { %v1463_v23 = vld [vmem:[%s1751_s0 + $0x68] sm:$0xff]   ;;  %v1351_v27 = vld [vmem:[%s1751_s0 + $0x70] sm:$0xff]   ;;  %v1355_v31 = vld [vmem:[%s1751_s0 + $0x78] sm:$0xff]  }
   0xb   :  { %325 = vmatpush1.bf16.msra.mxu0 %v1326_v6  ;;  %1311 = vmatpush1.bf16.msra.mxu1 %v1326_v6  ;;  %v1353_v28 = vld [vmem:[%s1750_s1 + $0x80] ss:$12 sps:$4 sm:$0xff]   ;;  %v1357_v32 = vld [vmem:[%s1750_s1 + $0xb0] ss:$12 sps:$4 sm:$0xff]  }
   0xc   :  { %326 = vmatprep.subr.bf16.mxu0 %v1327_v7  ;;  %1304 = vmatprep.subr.bf16.mxu1 %v1327_v7  ;;  %v1358_v33 = vld [vmem:[%s1751_s0 + $0x20] sm:$0xff]   ;;  %v1359_v34 = vld [vmem:[%s1751_s0 + $0x28] sm:$0xff]   ;;  %v1360_v35 = vld [vmem:[%s1751_s0 + $0x30] sm:$0xff]  }
   0xd   :  { %v1361_v36 = vld [vmem:[%s1751_s0 + $0x38] sm:$0xff]   ;;  %v1362_v37 = vld [vmem:[%s1751_s0 + $0x40] sm:$0xff]   ;;  %v1363_v38 = vld [vmem:[%s1751_s0 + $0x48] sm:$0xff]  }
   0xe   :  { %v1364_v39 = vld [vmem:[%s1751_s0 + $0x50] sm:$0xff]   ;;  %v1365_v40 = vld [vmem:[%s1751_s0 + $0x58] sm:$0xff]   ;;  %v1537_v44 = vld [vmem:[%s1752_s2] sm:$0x7] }
   0xf   :  { %327 = vmatpush1.bf16.msra.mxu0 %v1329_v8  ;;  %1312 = vmatpush1.bf16.msra.mxu1 %v1329_v8  ;;  %v1541_v46 = vrot.slane %v1537_v44, %v83_v43  ;;  %v1544_v47 = vrot.slane %v1537_v44, %v87_v45 }
  0x10   :  { %328 = vmatprep.subr.bf16.mxu0 %v1330_v9  ;;  %1305 = vmatprep.subr.bf16.mxu1 %v1330_v9 }
  0x13   :  { %329 = vmatpush1.bf16.msra.mxu0 %v1332_v10  ;;  %1313 = vmatpush1.bf16.msra.mxu1 %v1332_v10 }
  0x14   :  { %330 = vmatprep.subr.bf16.mxu0 %v1333_v11  ;;  %1306 = vmatprep.subr.bf16.mxu1 %v1333_v11 }
  0x17   :  { %331 = vmatpush1.bf16.msra.mxu0 %v1335_v12  ;;  %1314 = vmatpush1.bf16.msra.mxu1 %v1335_v12 }
  0x18   :  { %332 = vmatprep.subr.bf16.mxu0 %v1336_v13  ;;  %1307 = vmatprep.subr.bf16.mxu1 %v1336_v13 }
  0x1b   :  { %333 = vmatpush1.bf16.msra.mxu0 %v1338_v14  ;;  %1315 = vmatpush1.bf16.msra.mxu1 %v1338_v14 }
  0x1c   :  { %334 = vmatprep.subr.bf16.mxu0 %v1339_v15  ;;  %1308 = vmatprep.subr.bf16.mxu1 %v1339_v15 }
  0x1f   :  { %335 = vmatpush1.bf16.msra.mxu0 %v1341_v16  ;;  %1316 = vmatpush1.bf16.msra.mxu1 %v1341_v16 }
  0x20   :  { %1253 = vmatprep.subr.bf16.mxu1 %v1344_v17 }
  0x22   :  { %353 = vmatmul.mubr.bf16.vlgmr.msra.gmra.mrb[0].mxu0 %v1342_v18  ;;  %473 = vmatmul.mubr.bf16.vlgmr.msra.gmra.mrb[0].mxu1 %v1446_v19 }
  0x23   :  { %1254 = vmatpush3.bf16.msra.mxu1 %v1344_v17  ;;  %362 = vmatprep.mubr.bf16.mxu0 %v1366_v1 }
  0x24   :  { %1255 = vmatprep.subr.bf16.mxu1 %v1345_v20  ;;  %482 = vmatprep.mubr.bf16.mxu1 %v1366_v1 }
  0x27   :  { %1256 = vmatpush3.bf16.msra.mxu1 %v1345_v20 }
  0x28   :  { %1257 = vmatprep.subr.bf16.mxu1 %v1348_v21 }
  0x2a   :  { %363 = vmatmul.mubr.bf16.gmra.mrb[4].mxu0 %v1346_v22  ;;  %483 = vmatmul.mubr.bf16.gmra.mrb[4].mxu1 %v1463_v23 }
  0x2b   :  { %1258 = vmatpush3.bf16.msra.mxu1 %v1348_v21  ;;  %372 = vmatprep.mubr.bf16.mxu0 %v1366_v1 }
  0x2c   :  { %1259 = vmatprep.subr.bf16.mxu1 %v1349_v24  ;;  %492 = vmatprep.mubr.bf16.mxu1 %v1366_v1 }
  0x2f   :  { %1260 = vmatpush3.bf16.msra.mxu1 %v1349_v24 }
  0x30   :  { %1261 = vmatprep.subr.bf16.mxu1 %v1352_v25 }
  0x32   :  { %373 = vmatmul.mubr.bf16.gmra.mrb[8].mxu0 %v1350_v26  ;;  %493 = vmatmul.mubr.bf16.gmra.mrb[8].mxu1 %v1351_v27 }
  0x33   :  { %1262 = vmatpush3.bf16.msra.mxu1 %v1352_v25  ;;  %382 = vmatprep.mubr.bf16.mxu0 %v1366_v1 }
  0x34   :  { %1263 = vmatprep.subr.bf16.mxu1 %v1353_v28  ;;  %502 = vmatprep.mubr.bf16.mxu1 %v1366_v1 }
  0x37   :  { %1264 = vmatpush3.bf16.msra.mxu1 %v1353_v28 }
  0x38   :  { %1265 = vmatprep.subr.bf16.mxu1 %v1356_v29 }
  0x3a   :  { %383 = vmatmul.mubr.bf16.gmra.mrb[12].mxu0 %v1354_v30  ;;  %503 = vmatmul.mubr.bf16.gmra.mrb[12].mxu1 %v1355_v31 }
  0x3b   :  { %1266 = vmatpush3.bf16.msra.mxu1 %v1356_v29  ;;  %392 = vmatprep.mubr.bf16.mxu0 %v1366_v1 }
  0x3c   :  { %1267 = vmatprep.subr.bf16.mxu1 %v1357_v32  ;;  %1269 = vmatprep.mubr.bf16.mxu1 %v1342_v18 }
  0x3f   :  { %1268 = vmatpush3.bf16.msra.mxu1 %v1357_v32 }
  0x42   :  { %393 = vmatmul.mubr.bf16.gmra.mrb[16].mxu0 %v1358_v33  ;;  %1270 = vmatmul.mubr.bf16.vlgmr.msra.gmra.mrb[16].mxu1 %v1346_v22 }
  0x43   :  { %402 = vmatprep.mubr.bf16.mxu0 %v1366_v1  ;;  %1273 = vmatprep.mubr.bf16.mxu1 %v1350_v26 }
  0x4a   :  { %403 = vmatmul.mubr.bf16.gmra.mrb[20].mxu0 %v1359_v34  ;;  %1274 = vmatmul.mubr.bf16.gmra.mrb[20].mxu1 %v1354_v30 }
  0x4b   :  { %412 = vmatprep.mubr.bf16.mxu0 %v1366_v1  ;;  %1277 = vmatprep.mubr.bf16.mxu1 %v1358_v33 }
  0x52   :  { %413 = vmatmul.mubr.bf16.gmra.mrb[24].mxu0 %v1360_v35  ;;  %1278 = vmatmul.mubr.bf16.gmra.mrb[24].mxu1 %v1359_v34 }
  0x53   :  { %422 = vmatprep.mubr.bf16.mxu0 %v1366_v1  ;;  %1281 = vmatprep.mubr.bf16.mxu1 %v1360_v35 }
  0x5a   :  { %423 = vmatmul.mubr.bf16.gmra.mrb[28].mxu0 %v1361_v36  ;;  %1282 = vmatmul.mubr.bf16.gmra.mrb[28].mxu1 %v1361_v36 }
  0x5b   :  { %432 = vmatprep.mubr.bf16.mxu0 %v1366_v1  ;;  %1285 = vmatprep.mubr.bf16.mxu1 %v1362_v37 }
  0x62   :  { %433 = vmatmul.mubr.bf16.gmra.mrb[32].mxu0 %v1362_v37  ;;  %1286 = vmatmul.mubr.bf16.gmra.mrb[32].mxu1 %v1363_v38 }
  0x63   :  { %442 = vmatprep.mubr.bf16.mxu0 %v1366_v1  ;;  %1289 = vmatprep.mubr.bf16.mxu1 %v1364_v39 }
  0x6a   :  { %443 = vmatmul.mubr.bf16.gmra.mrb[36].mxu0 %v1363_v38  ;;  %1290 = vmatmul.mubr.bf16.gmra.mrb[36].mxu1 %v1365_v40 }
  0x6b   :  { %452 = vmatprep.mubr.bf16.mxu0 %v1366_v1  ;;  %1293 = vmatprep.mubr.bf16.mxu1 %v1446_v19 }
  0x72   :  { %453 = vmatmul.mubr.bf16.gmra.mrb[40].mxu0 %v1364_v39  ;;  %1294 = vmatmul.mubr.bf16.gmra.mrb[40].mxu1 %v1463_v23 }
  0x73   :  { %462 = vmatprep.mubr.bf16.mxu0 %v1366_v1  ;;  %1297 = vmatprep.mubr.bf16.mxu1 %v1351_v27 }
  0x7a   :  { %463 = vmatmul.mubr.bf16.gmra.mrb[44].mxu0 %v1365_v40  ;;  %1298 = vmatmul.mubr.bf16.gmra.mrb[44].mxu1 %v1355_v31 }
  0xf5   :  { %v354_v48 = vpop.f32.mrb[0].mxu0  ;;  %v474_v49 = vpop.f32.mrb[0].mxu1 }
  0xf6   :  { %v355_v50 = vadd.f32 %v354_v48, %v1541_v46  ;;  %v475_v51 = vadd.f32 %v474_v49, %v1541_v46  ;;  %v356_v52 = vpop.f32.mrb[1].mxu0  ;;  %v476_v53 = vpop.f32.mrb[1].mxu1 }
  0xf7   :  { %v357_v54 = vadd.f32 %v356_v52, %v1544_v47  ;;  %v477_v55 = vadd.f32 %v476_v53, %v1544_v47  ;;  %v358_v56 = vpop.f32.mrb[2].mxu0  ;;  %v478_v57 = vpop.f32.mrb[2].mxu1 }
  0xf8   :  { %v674_v58 = vmax.f32 %v355_v50, 0.0  ;;  %v746_v59 = vmax.f32 %v475_v51, 0.0  ;;  %v359_v60 = vadd.f32 %v358_v56, %v1541_v46  ;;  %v479_v61 = vadd.f32 %v478_v57, %v1541_v46  ;;  %v360_v62 = vpop.f32.mrb[3].mxu0  ;;  %v480_v63 = vpop.f32.mrb[3].mxu1 }
  0xf9   :  { %v675_v0 = vmax.f32 %v357_v54, 0.0  ;;  %v747_v1 = vmax.f32 %v477_v55, 0.0  ;;  %v361_v2 = vadd.f32 %v360_v62, %v1544_v47  ;;  %v481_v3 = vadd.f32 %v480_v63, %v1544_v47 }
  0xfa   :  { %v677_v4 = vmax.f32 %v359_v60, 0.0  ;;  %v749_v5 = vmax.f32 %v479_v61, 0.0 }
  0xfb   :  { %v1554_v6 = vadd.f32 %v675_v0, %v674_v58  ;;  %v1556_v7 = vadd.f32 %v747_v1, %v746_v59  ;;  %v678_v8 = vmax.f32 %v361_v2, 0.0  ;;  %v750_v9 = vmax.f32 %v481_v3, 0.0 }
  0xfd   :  { %v1558_v10 = vadd.f32 %v678_v8, %v677_v4  ;;  %v1560_v11 = vadd.f32 %v750_v9, %v749_v5  ;;  %v364_v12 = vpop.f32.mrb[4].mxu0  ;;  %v484_v13 = vpop.f32.mrb[4].mxu1 }
  0xfe   :  { %v365_v14 = vadd.f32 %v364_v12, %v1541_v46  ;;  %v485_v15 = vadd.f32 %v484_v13, %v1541_v46  ;;  %v366_v16 = vpop.f32.mrb[5].mxu0  ;;  %v486_v17 = vpop.f32.mrb[5].mxu1 }
  0xff   :  { %v367_v18 = vadd.f32 %v366_v16, %v1544_v47  ;;  %v487_v19 = vadd.f32 %v486_v17, %v1544_v47  ;;  %v368_v20 = vpop.f32.mrb[6].mxu0  ;;  %v488_v21 = vpop.f32.mrb[6].mxu1 }
 0x100   :  { %v680_v22 = vmax.f32 %v365_v14, 0.0  ;;  %v752_v23 = vmax.f32 %v485_v15, 0.0  ;;  %v369_v24 = vadd.f32 %v368_v20, %v1541_v46  ;;  %v489_v25 = vadd.f32 %v488_v21, %v1541_v46  ;;  %v370_v26 = vpop.f32.mrb[7].mxu0  ;;  %v490_v27 = vpop.f32.mrb[7].mxu1 }
 0x101   :  { %v681_v28 = vmax.f32 %v367_v18, 0.0  ;;  %v753_v29 = vmax.f32 %v487_v19, 0.0  ;;  %v371_v30 = vadd.f32 %v370_v26, %v1544_v47  ;;  %v491_v31 = vadd.f32 %v490_v27, %v1544_v47 }
 0x102   :  { %v683_v32 = vmax.f32 %v369_v24, 0.0  ;;  %v755_v33 = vmax.f32 %v489_v25, 0.0  ;;  %v91_v18 = vsub.s32 2, %v1531_v42 }
 0x103   :  { %v1570_v34 = vadd.f32 %v681_v28, %v680_v22  ;;  %v1572_v35 = vadd.f32 %v753_v29, %v752_v23  ;;  %v684_v36 = vmax.f32 %v371_v30, 0.0  ;;  %v756_v37 = vmax.f32 %v491_v31, 0.0 }
 0x105   :  { %v1574_v38 = vadd.f32 %v684_v36, %v683_v32  ;;  %v1576_v39 = vadd.f32 %v756_v37, %v755_v33  ;;  %v374_v40 = vpop.f32.mrb[8].mxu0  ;;  %v494_v41 = vpop.f32.mrb[8].mxu1  ;;  %v1604_v36 = vrot.slane %v1537_v44, %v91_v18 }
 0x106   :  { %v375_v43 = vadd.f32 %v374_v40, %v1541_v46  ;;  %v495_v45 = vadd.f32 %v494_v41, %v1541_v46  ;;  %v376_v48 = vpop.f32.mrb[9].mxu0  ;;  %v496_v49 = vpop.f32.mrb[9].mxu1 }
 0x107   :  { %v377_v50 = vadd.f32 %v376_v48, %v1544_v47  ;;  %v497_v51 = vadd.f32 %v496_v49, %v1544_v47  ;;  %v378_v52 = vpop.f32.mrb[10].mxu0  ;;  %v498_v53 = vpop.f32.mrb[10].mxu1 }
 0x108   :  { %v686_v54 = vmax.f32 %v375_v43, 0.0  ;;  %v758_v55 = vmax.f32 %v495_v45, 0.0  ;;  %v379_v56 = vadd.f32 %v378_v52, %v1541_v46  ;;  %v499_v57 = vadd.f32 %v498_v53, %v1541_v46  ;;  %v380_v58 = vpop.f32.mrb[11].mxu0  ;;  %v500_v59 = vpop.f32.mrb[11].mxu1 }
 0x109   :  { %v687_v60 = vmax.f32 %v377_v50, 0.0  ;;  %v759_v61 = vmax.f32 %v497_v51, 0.0  ;;  %v381_v62 = vadd.f32 %v380_v58, %v1544_v47  ;;  %v501_v63 = vadd.f32 %v500_v59, %v1544_v47 }
 0x10a   :  { %v689_v0 = vmax.f32 %v379_v56, 0.0  ;;  %v761_v1 = vmax.f32 %v499_v57, 0.0 }
 0x10b   :  { %v1586_v2 = vadd.f32 %v687_v60, %v686_v54  ;;  %v1588_v3 = vadd.f32 %v759_v61, %v758_v55  ;;  %v690_v4 = vmax.f32 %v381_v62, 0.0  ;;  %v762_v5 = vmax.f32 %v501_v63, 0.0 }
 0x10d   :  { %v1590_v8 = vadd.f32 %v690_v4, %v689_v0  ;;  %v1592_v9 = vadd.f32 %v762_v5, %v761_v1  ;;  %v384_v12 = vpop.f32.mrb[12].mxu0  ;;  %v504_v13 = vpop.f32.mrb[12].mxu1 }
 0x10e   :  { %v385_v14 = vadd.f32 %v384_v12, %v1541_v46  ;;  %v505_v15 = vadd.f32 %v504_v13, %v1541_v46  ;;  %v386_v16 = vpop.f32.mrb[13].mxu0  ;;  %v506_v17 = vpop.f32.mrb[13].mxu1 }
 0x10f   :  { %v387_v19 = vadd.f32 %v386_v16, %v1544_v47  ;;  %v507_v20 = vadd.f32 %v506_v17, %v1544_v47  ;;  %v388_v21 = vpop.f32.mrb[14].mxu0  ;;  %v508_v22 = vpop.f32.mrb[14].mxu1 }
 0x110   :  { %v692_v23 = vmax.f32 %v385_v14, 0.0  ;;  %v764_v24 = vmax.f32 %v505_v15, 0.0  ;;  %v389_v25 = vadd.f32 %v388_v21, %v1541_v46  ;;  %v509_v26 = vadd.f32 %v508_v22, %v1541_v46  ;;  %v390_v27 = vpop.f32.mrb[15].mxu0  ;;  %v510_v28 = vpop.f32.mrb[15].mxu1 }
 0x111   :  { %v693_v29 = vmax.f32 %v387_v19, 0.0  ;;  %v765_v30 = vmax.f32 %v507_v20, 0.0  ;;  %v391_v31 = vadd.f32 %v390_v27, %v1544_v47  ;;  %v511_v42 = vadd.f32 %v510_v28, %v1544_v47 }
 0x112   :  { %v695_v32 = vmax.f32 %v389_v25, 0.0  ;;  %v767_v33 = vmax.f32 %v509_v26, 0.0 }
 0x113   :  { %v776_v37 = vadd.f32 %v693_v29, %v692_v23  ;;  %v1606_v40 = vadd.f32 %v765_v30, %v764_v24  ;;  %v696_v41 = vmax.f32 %v391_v31, 0.0  ;;  %v768_v43 = vmax.f32 %v511_v42, 0.0 }
 0x115   :  { %v1608_v45 = vadd.f32 %v696_v41, %v695_v32  ;;  %v1610_v48 = vadd.f32 %v768_v43, %v767_v33  ;;  %v394_v49 = vpop.f32.mrb[16].mxu0  ;;  %v1271_v50 = vpop.f32.mrb[16].mxu1 }
 0x116   :  { %v395_v51 = vadd.f32 %v394_v49, %v1541_v46  ;;  %v556_v52 = vadd.f32 %v1271_v50, %v1604_v36  ;;  %v396_v53 = vpop.f32.mrb[17].mxu0  ;;  %v547_v54 = vpop.f32.mrb[17].mxu1 }
 0x117   :  { %v397_v44 = vadd.f32 %v396_v53, %v1544_v47  ;;  %v548_v55 = vadd.f32 %v547_v54, %v1604_v36  ;;  %v398_v56 = vpop.f32.mrb[18].mxu0  ;;  %v1272_v57 = vpop.f32.mrb[18].mxu1 }
 0x118   :  { %v698_v58 = vmax.f32 %v395_v51, 0.0  ;;  %v682_v59 = vmax.f32 %v556_v52, 0.0  ;;  %v399_v60 = vadd.f32 %v398_v56, %v1541_v46  ;;  %v559_v61 = vadd.f32 %v1272_v57, %v1604_v36  ;;  %v400_v62 = vpop.f32.mrb[19].mxu0  ;;  %v550_v63 = vpop.f32.mrb[19].mxu1 }
 0x119   :  { %v699_v0 = vmax.f32 %v397_v44, 0.0  ;;  %v676_v1 = vmax.f32 %v548_v55, 0.0  ;;  %v401_v4 = vadd.f32 %v400_v62, %v1544_v47  ;;  %v551_v5 = vadd.f32 %v550_v63, %v1604_v36 }
 0x11a   :  { %v804_v12 = vadd.f32 %v1570_v34, %v682_v59  ;;  %v701_v13 = vmax.f32 %v399_v60, 0.0  ;;  %v685_v14 = vmax.f32 %v559_v61, 0.0 }
 0x11b   :  { %v1621_v15 = vadd.f32 %v699_v0, %v698_v58  ;;  %v802_v16 = vadd.f32 %v1554_v6, %v676_v1  ;;  %v702_v17 = vmax.f32 %v401_v4, 0.0  ;;  %v679_v18 = vmax.f32 %v551_v5, 0.0 }
 0x11c   :  { %v805_v19 = vadd.f32 %v1574_v38, %v685_v14  ;;  %v836_v24 = vmul.f32 0.33333334, %v804_v12 }
 0x11d   :  { %v1625_v20 = vadd.f32 %v702_v17, %v701_v13  ;;  %v803_v21 = vadd.f32 %v1558_v10, %v679_v18  ;;  %v404_v22 = vpop.f32.mrb[20].mxu0  ;;  %v1275_v23 = vpop.f32.mrb[20].mxu1  ;;  %v834_v29 = vmul.f32 0.33333334, %v802_v16 }
 0x11e   :  { %v837_v25 = vmul.f32 0.33333334, %v805_v19  ;;  %v405_v34 = vadd.f32 %v404_v22, %v1541_v46  ;;  %v572_v26 = vadd.f32 %v1275_v23, %v1604_v36  ;;  %v406_v27 = vpop.f32.mrb[21].mxu0  ;;  %v563_v28 = vpop.f32.mrb[21].mxu1 }
 0x11f   :  { %v835_v6 = vmul.f32 0.33333334, %v803_v21  ;;  %v407_v30 = vadd.f32 %v406_v27, %v1544_v47  ;;  %v564_v38 = vadd.f32 %v563_v28, %v1604_v36  ;;  %v408_v31 = vpop.f32.mrb[22].mxu0  ;;  %v1276_v42 = vpop.f32.mrb[22].mxu1 }
 0x120   :  { %v1142_v32 = vpack.c.bf16 %v837_v25, %v836_v24  ;;  %v704_v10 = vmax.f32 %v405_v34, 0.0  ;;  %v694_v33 = vmax.f32 %v572_v26, 0.0  ;;  %v409_v41 = vadd.f32 %v408_v31, %v1541_v46  ;;  %v410_v43 = vpop.f32.mrb[23].mxu0  ;;  %v566_v49 = vpop.f32.mrb[23].mxu1 }
 0x121   :  { %v1137_v50 = vpack.c.bf16 %v835_v6, %v834_v29  ;;  %v705_v51 = vmax.f32 %v407_v30, 0.0  ;;  %v688_v52 = vmax.f32 %v564_v38, 0.0  ;;  %v575_v53 = vadd.f32 %v1276_v42, %v1604_v36 }
 0x122   :  { %1214 = vst [vmem:[%s1753_s3 + $0x8] sm:$0xff] %v1142_v32   ;;  %v808_v54 = vadd.f32 %v776_v37, %v694_v33  ;;  %v707_v44 = vmax.f32 %v409_v41, 0.0  ;;  %v411_v55 = vadd.f32 %v410_v43, %v1544_v47  ;;  %v567_v56 = vadd.f32 %v566_v49, %v1604_v36 }
 0x123   :  { %1138 = vst [vmem:[%s1753_s3] sm:$0xff] %v1137_v50   ;;  %v780_v57 = vadd.f32 %v705_v51, %v704_v10  ;;  %v806_v58 = vadd.f32 %v1586_v2, %v688_v52  ;;  %v697_v59 = vmax.f32 %v575_v53, 0.0 }
 0x124   :  { %v708_v60 = vmax.f32 %v411_v55, 0.0  ;;  %v691_v61 = vmax.f32 %v567_v56, 0.0  ;;  %v840_v62 = vmul.f32 0.33333334, %v808_v54 }
 0x125   :  { %v809_v63 = vadd.f32 %v1608_v45, %v697_v59  ;;  %v414_v0 = vpop.f32.mrb[24].mxu0  ;;  %v1279_v37 = vpop.f32.mrb[24].mxu1  ;;  %v838_v16 = vmul.f32 0.33333334, %v806_v58 }
 0x126   :  { %v781_v1 = vadd.f32 %v708_v60, %v707_v44  ;;  %v807_v4 = vadd.f32 %v1590_v8, %v691_v61  ;;  %v415_v5 = vadd.f32 %v414_v0, %v1541_v46  ;;  %v588_v12 = vadd.f32 %v1279_v37, %v1604_v36  ;;  %v416_v13 = vpop.f32.mrb[25].mxu0  ;;  %v579_v14 = vpop.f32.mrb[25].mxu1 }
 0x127   :  { %v841_v17 = vmul.f32 0.33333334, %v809_v63  ;;  %v417_v2 = vadd.f32 %v416_v13, %v1544_v47  ;;  %v580_v18 = vadd.f32 %v579_v14, %v1604_v36  ;;  %v418_v19 = vpop.f32.mrb[26].mxu0  ;;  %v1280_v21 = vpop.f32.mrb[26].mxu1 }
 0x128   :  { %v839_v45 = vmul.f32 0.33333334, %v807_v4  ;;  %v710_v22 = vmax.f32 %v415_v5, 0.0  ;;  %v706_v23 = vmax.f32 %v588_v12, 0.0  ;;  %v419_v24 = vadd.f32 %v418_v19, %v1541_v46  ;;  %v420_v8 = vpop.f32.mrb[27].mxu0  ;;  %v582_v25 = vpop.f32.mrb[27].mxu1 }
 0x129   :  { %v1152_v34 = vpack.c.bf16 %v841_v17, %v840_v62  ;;  %v711_v26 = vmax.f32 %v417_v2, 0.0  ;;  %v700_v27 = vmax.f32 %v580_v18, 0.0  ;;  %v591_v28 = vadd.f32 %v1280_v21, %v1604_v36 }
 0x12a   :  { %v1147_v29 = vpack.c.bf16 %v839_v45, %v838_v16  ;;  %v812_v6 = vadd.f32 %v780_v57, %v706_v23  ;;  %v713_v30 = vmax.f32 %v419_v24, 0.0  ;;  %v421_v38 = vadd.f32 %v420_v8, %v1544_v47 }
 0x12b   :  { %1216 = vst [vmem:[%s1753_s3 + $0x18] sm:$0xff] %v1152_v34   ;;  %v782_v31 = vadd.f32 %v711_v26, %v710_v22  ;;  %v810_v42 = vadd.f32 %v1621_v15, %v700_v27  ;;  %v709_v32 = vmax.f32 %v591_v28, 0.0  ;;  %v583_v10 = vadd.f32 %v582_v25, %v1604_v36 }
 0x12c   :  { %1215 = vst [vmem:[%s1753_s3 + $0x10] sm:$0xff] %v1147_v29   ;;  %v714_v33 = vmax.f32 %v421_v38, 0.0  ;;  %v844_v51 = vmul.f32 0.33333334, %v812_v6 }
 0x12d   :  { %v813_v41 = vadd.f32 %v781_v1, %v709_v32  ;;  %v703_v43 = vmax.f32 %v583_v10, 0.0  ;;  %v424_v49 = vpop.f32.mrb[28].mxu0  ;;  %v1283_v50 = vpop.f32.mrb[28].mxu1  ;;  %v842_v61 = vmul.f32 0.33333334, %v810_v42 }
 0x12e   :  { %v783_v52 = vadd.f32 %v714_v33, %v713_v30  ;;  %v425_v53 = vadd.f32 %v424_v49, %v1541_v46  ;;  %v604_v54 = vadd.f32 %v1283_v50, %v1604_v36  ;;  %v426_v44 = vpop.f32.mrb[29].mxu0  ;;  %v595_v15 = vpop.f32.mrb[29].mxu1 }
 0x12f   :  { %v845_v55 = vmul.f32 0.33333334, %v813_v41  ;;  %v811_v56 = vadd.f32 %v1625_v20, %v703_v43  ;;  %v427_v57 = vadd.f32 %v426_v44, %v1544_v47  ;;  %v596_v58 = vadd.f32 %v595_v15, %v1604_v36  ;;  %v428_v59 = vpop.f32.mrb[30].mxu0  ;;  %v1284_v60 = vpop.f32.mrb[30].mxu1 }
 0x130   :  { %v716_v62 = vmax.f32 %v425_v53, 0.0  ;;  %v718_v63 = vmax.f32 %v604_v54, 0.0  ;;  %v429_v0 = vadd.f32 %v428_v59, %v1541_v46  ;;  %v430_v37 = vpop.f32.mrb[31].mxu0  ;;  %v598_v1 = vpop.f32.mrb[31].mxu1  ;;  %v607_v20 = vadd.f32 %v1284_v60, %v1604_v36 }
 0x131   :  { %v1162_v4 = vpack.c.bf16 %v845_v55, %v844_v51  ;;  %v843_v5 = vmul.f32 0.33333334, %v811_v56  ;;  %v717_v12 = vmax.f32 %v427_v57, 0.0  ;;  %v712_v13 = vmax.f32 %v596_v58, 0.0 }
 0x132   :  { %v719_v14 = vmax.f32 %v429_v0, 0.0  ;;  %v431_v16 = vadd.f32 %v430_v37, %v1544_v47  ;;  %v599_v17 = vadd.f32 %v598_v1, %v1604_v36  ;;  %v721_v8 = vmax.f32 %v607_v20, 0.0 }
 0x133   :  { %1218 = vst [vmem:[%s1753_s3 + $0x28] sm:$0xff] %v1162_v4   ;;  %v1157_v2 = vpack.c.bf16 %v843_v5, %v842_v61  ;;  %v784_v18 = vadd.f32 %v717_v12, %v716_v62  ;;  %v814_v19 = vadd.f32 %v782_v31, %v712_v13 }
 0x134   :  { %v720_v21 = vmax.f32 %v431_v16, 0.0  ;;  %v715_v45 = vmax.f32 %v599_v17, 0.0 }
 0x135   :  { %1217 = vst [vmem:[%s1753_s3 + $0x20] sm:$0xff] %v1157_v2   ;;  %v816_v22 = vadd.f32 %v784_v18, %v718_v63  ;;  %v434_v23 = vpop.f32.mrb[32].mxu0  ;;  %v1287_v24 = vpop.f32.mrb[32].mxu1  ;;  %v846_v29 = vmul.f32 0.33333334, %v814_v19 }
 0x136   :  { %v785_v25 = vadd.f32 %v720_v21, %v719_v14  ;;  %v815_v34 = vadd.f32 %v783_v52, %v715_v45  ;;  %v435_v26 = vadd.f32 %v434_v23, %v1541_v46  ;;  %v436_v27 = vpop.f32.mrb[33].mxu0  ;;  %v611_v28 = vpop.f32.mrb[33].mxu1  ;;  %v620_v1 = vadd.f32 %v1287_v24, %v1604_v36 }
 0x137   :  { %v437_v6 = vadd.f32 %v436_v27, %v1544_v47  ;;  %v612_v30 = vadd.f32 %v611_v28, %v1604_v36  ;;  %v438_v38 = vpop.f32.mrb[34].mxu0  ;;  %v1288_v31 = vpop.f32.mrb[34].mxu1  ;;  %v848_v43 = vmul.f32 0.33333334, %v816_v22 }
 0x138   :  { %v817_v42 = vadd.f32 %v785_v25, %v721_v8  ;;  %v847_v32 = vmul.f32 0.33333334, %v815_v34  ;;  %v722_v10 = vmax.f32 %v435_v26, 0.0  ;;  %v440_v33 = vpop.f32.mrb[35].mxu0  ;;  %v614_v41 = vpop.f32.mrb[35].mxu1  ;;  %v439_v51 = vadd.f32 %v438_v38, %v1541_v46 }
 0x139   :  { %v723_v49 = vmax.f32 %v437_v6, 0.0  ;;  %v724_v50 = vmax.f32 %v612_v30, 0.0  ;;  %v441_v54 = vadd.f32 %v440_v33, %v1544_v47  ;;  %v615_v44 = vadd.f32 %v614_v41, %v1604_v36 }
 0x13a   :  { %v849_v52 = vmul.f32 0.33333334, %v817_v42  ;;  %v1167_v53 = vpack.c.bf16 %v847_v32, %v846_v29  ;;  %v725_v55 = vmax.f32 %v439_v51, 0.0  ;;  %v623_v2 = vadd.f32 %v1288_v31, %v1604_v36 }
 0x13b   :  { %v786_v15 = vadd.f32 %v723_v49, %v722_v10  ;;  %v726_v57 = vmax.f32 %v441_v54, 0.0  ;;  %v727_v62 = vmax.f32 %v615_v44, 0.0  ;;  %v730_v8 = vmax.f32 %v620_v1, 0.0 }
 0x13c   :  { %v1172_v56 = vpack.c.bf16 %v849_v52, %v848_v43  ;;  %1219 = vst [vmem:[%s1753_s3 + $0x30] sm:$0xff] %v1167_v53   ;;  %v733_v27 = vmax.f32 %v623_v2, 0.0 }
 0x13d   :  { %v818_v58 = vadd.f32 %v786_v15, %v724_v50  ;;  %v444_v59 = vpop.f32.mrb[36].mxu0  ;;  %v1291_v60 = vpop.f32.mrb[36].mxu1  ;;  %v787_v61 = vadd.f32 %v726_v57, %v725_v55 }
 0x13e   :  { %1220 = vst [vmem:[%s1753_s3 + $0x38] sm:$0xff] %v1172_v56   ;;  %v445_v63 = vadd.f32 %v444_v59, %v1541_v46  ;;  %v446_v0 = vpop.f32.mrb[37].mxu0  ;;  %v627_v37 = vpop.f32.mrb[37].mxu1  ;;  %v1693_v18 = vadd.f32 %v1291_v60, %v1604_v36 }
 0x13f   :  { %v447_v4 = vadd.f32 %v446_v0, %v1544_v47  ;;  %v448_v5 = vpop.f32.mrb[38].mxu0  ;;  %v1292_v12 = vpop.f32.mrb[38].mxu1  ;;  %v819_v13 = vadd.f32 %v787_v61, %v727_v62  ;;  %v850_v45 = vmul.f32 0.33333334, %v818_v58  ;;  %v628_v23 = vadd.f32 %v627_v37, %v1604_v36 }
 0x140   :  { %v728_v14 = vmax.f32 %v445_v63, 0.0  ;;  %v449_v20 = vadd.f32 %v448_v5, %v1541_v46  ;;  %v450_v16 = vpop.f32.mrb[39].mxu0  ;;  %v630_v17 = vpop.f32.mrb[39].mxu1  ;;  %v742_v28 = vmax.f32 %v1693_v18, 0.0 }
 0x141   :  { %v729_v19 = vmax.f32 %v447_v4, 0.0  ;;  %v451_v21 = vadd.f32 %v450_v16, %v1544_v47  ;;  %v851_v22 = vmul.f32 0.33333334, %v819_v13  ;;  %v736_v31 = vmax.f32 %v628_v23, 0.0 }
 0x142   :  { %v731_v24 = vmax.f32 %v449_v20, 0.0  ;;  %v631_v42 = vadd.f32 %v630_v17, %v1604_v36 }
 0x143   :  { %v788_v25 = vadd.f32 %v729_v19, %v728_v14  ;;  %v732_v34 = vmax.f32 %v451_v21, 0.0  ;;  %v1177_v26 = vpack.c.bf16 %v851_v22, %v850_v45  ;;  %v639_v14 = vadd.f32 %v1292_v12, %v1604_v36 }
 0x144   :  { %v739_v20 = vmax.f32 %v631_v42, 0.0 }
 0x145   :  { %v820_v29 = vadd.f32 %v788_v25, %v730_v8  ;;  %v789_v6 = vadd.f32 %v732_v34, %v731_v24  ;;  %v454_v30 = vpop.f32.mrb[40].mxu0  ;;  %v1295_v38 = vpop.f32.mrb[40].mxu1  ;;  %1221 = vst [vmem:[%s1753_s3 + $0x40] sm:$0xff] %v1177_v26  }
 0x146   :  { %v455_v32 = vadd.f32 %v454_v30, %v1541_v46  ;;  %v652_v10 = vadd.f32 %v1295_v38, %v1604_v36  ;;  %v456_v33 = vpop.f32.mrb[41].mxu0  ;;  %v643_v41 = vpop.f32.mrb[41].mxu1 }
 0x147   :  { %v852_v43 = vmul.f32 0.33333334, %v820_v29  ;;  %v821_v49 = vadd.f32 %v789_v6, %v733_v27  ;;  %v457_v50 = vadd.f32 %v456_v33, %v1544_v47  ;;  %v644_v51 = vadd.f32 %v643_v41, %v1604_v36  ;;  %v458_v52 = vpop.f32.mrb[42].mxu0  ;;  %v1296_v53 = vpop.f32.mrb[42].mxu1 }
 0x148   :  { %v734_v54 = vmax.f32 %v455_v32, 0.0  ;;  %v754_v44 = vmax.f32 %v652_v10, 0.0  ;;  %v459_v15 = vadd.f32 %v458_v52, %v1541_v46  ;;  %v655_v55 = vadd.f32 %v1296_v53, %v1604_v36  ;;  %v460_v56 = vpop.f32.mrb[43].mxu0  ;;  %v646_v57 = vpop.f32.mrb[43].mxu1 }
 0x149   :  { %v853_v58 = vmul.f32 0.33333334, %v821_v49  ;;  %v735_v59 = vmax.f32 %v457_v50, 0.0  ;;  %v748_v60 = vmax.f32 %v644_v51, 0.0  ;;  %v461_v61 = vadd.f32 %v460_v56, %v1544_v47 }
 0x14a   :  { %v828_v62 = vadd.f32 %v1572_v35, %v754_v44  ;;  %v737_v63 = vmax.f32 %v459_v15, 0.0  ;;  %v757_v0 = vmax.f32 %v655_v55, 0.0  ;;  %v647_v37 = vadd.f32 %v646_v57, %v1604_v36 }
 0x14b   :  { %v1182_v1 = vpack.c.bf16 %v853_v58, %v852_v43  ;;  %v790_v4 = vadd.f32 %v735_v59, %v734_v54  ;;  %v826_v5 = vadd.f32 %v1556_v7, %v748_v60  ;;  %v738_v13 = vmax.f32 %v461_v61, 0.0 }
 0x14c   :  { %v829_v16 = vadd.f32 %v1576_v39, %v757_v0  ;;  %v751_v17 = vmax.f32 %v647_v37, 0.0  ;;  %v860_v35 = vmul.f32 0.33333334, %v828_v62 }
 0x14d   :  { %1222 = vst [vmem:[%s1753_s3 + $0x48] sm:$0xff] %v1182_v1   ;;  %v822_v2 = vadd.f32 %v790_v4, %v736_v31  ;;  %v858_v19 = vmul.f32 0.33333334, %v826_v5  ;;  %v791_v21 = vadd.f32 %v738_v13, %v737_v63  ;;  %v464_v45 = vpop.f32.mrb[44].mxu0  ;;  %v1299_v22 = vpop.f32.mrb[44].mxu1 }
 0x14e   :  { %v861_v23 = vmul.f32 0.33333334, %v829_v16  ;;  %v827_v7 = vadd.f32 %v1560_v11, %v751_v17  ;;  %v465_v24 = vadd.f32 %v464_v45, %v1541_v46  ;;  %v668_v12 = vadd.f32 %v1299_v22, %v1604_v36  ;;  %v466_v8 = vpop.f32.mrb[45].mxu0  ;;  %v659_v39 = vpop.f32.mrb[45].mxu1 }
 0x14f   :  { %v854_v25 = vmul.f32 0.33333334, %v822_v2  ;;  %v823_v34 = vadd.f32 %v791_v21, %v739_v20  ;;  %v467_v26 = vadd.f32 %v466_v8, %v1544_v47  ;;  %v660_v27 = vadd.f32 %v659_v39, %v1604_v36  ;;  %v468_v29 = vpop.f32.mrb[46].mxu0  ;;  %v1300_v6 = vpop.f32.mrb[46].mxu1 }
 0x150   :  { %v1202_v30 = vpack.c.bf16 %v861_v23, %v860_v35  ;;  %v859_v38 = vmul.f32 0.33333334, %v827_v7  ;;  %v740_v31 = vmax.f32 %v465_v24, 0.0  ;;  %v766_v42 = vmax.f32 %v668_v12, 0.0  ;;  %v470_v32 = vpop.f32.mrb[47].mxu0  ;;  %v662_v11 = vpop.f32.mrb[47].mxu1 }
 0x151   :  { %v855_v10 = vmul.f32 0.33333334, %v823_v34  ;;  %v741_v33 = vmax.f32 %v467_v26, 0.0  ;;  %v760_v41 = vmax.f32 %v660_v27, 0.0  ;;  %v469_v43 = vadd.f32 %v468_v29, %v1541_v46 }
 0x152   :  { %1226 = vst [vmem:[%s1753_s3 + $0x68] sm:$0xff] %v1202_v30   ;;  %v1197_v49 = vpack.c.bf16 %v859_v38, %v858_v19  ;;  %v832_v50 = vadd.f32 %v1606_v40, %v766_v42  ;;  %v671_v51 = vadd.f32 %v1300_v6, %v1604_v36  ;;  %v471_v52 = vadd.f32 %v470_v32, %v1544_v47 }
 0x153   :  { %v1187_v53 = vpack.c.bf16 %v855_v10, %v854_v25  ;;  %v792_v54 = vadd.f32 %v741_v33, %v740_v31  ;;  %v830_v44 = vadd.f32 %v1588_v3, %v760_v41  ;;  %v743_v15 = vmax.f32 %v469_v43, 0.0 }
 0x154   :  { %1225 = vst [vmem:[%s1753_s3 + $0x60] sm:$0xff] %v1197_v49   ;;  %v769_v46 = vmax.f32 %v671_v51, 0.0  ;;  %v744_v55 = vmax.f32 %v471_v52, 0.0  ;;  %v663_v56 = vadd.f32 %v662_v11, %v1604_v36  ;;  %v745_v40 = vmax.f32 %v639_v14, 0.0 }
 0x155   :  { %1223 = vst [vmem:[%s1753_s3 + $0x50] sm:$0xff] %v1187_v53   ;;  %v824_v47 = vadd.f32 %v792_v54, %v742_v28  ;;  %v864_v59 = vmul.f32 0.33333334, %v832_v50  ;;  %v862_v63 = vmul.f32 0.33333334, %v830_v44 }
 0x156   :  { %v833_v57 = vadd.f32 %v1610_v48, %v769_v46  ;;  %v793_v3 = vadd.f32 %v744_v55, %v743_v15  ;;  %v763_v58 = vmax.f32 %v663_v56, 0.0 }
 0x157   :  { %v856_v0 = vmul.f32 0.33333334, %v824_v47 }
 0x158   :  { %v865_v60 = vmul.f32 0.33333334, %v833_v57  ;;  %v825_v61 = vadd.f32 %v793_v3, %v745_v40  ;;  %v831_v62 = vadd.f32 %v1592_v9, %v763_v58 }
 0x15a   :  { %v1212_v36 = vpack.c.bf16 %v865_v60, %v864_v59  ;;  %v857_v37 = vmul.f32 0.33333334, %v825_v61  ;;  %v863_v1 = vmul.f32 0.33333334, %v831_v62 }
 0x15c   :  { %1228 = vst [vmem:[%s1753_s3 + $0x78] sm:$0xff] %v1212_v36   ;;  %v1192_v18 = vpack.c.bf16 %v857_v37, %v856_v0  ;;  %v1207_v28 = vpack.c.bf16 %v863_v1, %v862_v63 }
 0x15e   :  { %1224 = vst [vmem:[%s1753_s3 + $0x58] sm:$0xff] %v1192_v18   ;;  %1227 = vst [vmem:[%s1753_s3 + $0x70] sm:$0xff] %v1207_v28  }

// kernel: afgcn_forward.5
= control target key start
LH: loop header
LB: loop body
LE: loop exit
PB: predicated region body
PF: predicated region fallthrough
CT: control target
= control target key end

     0   :  { %s2447_s1 = inlined_call_operand.vmem [shape: bf16[256,128], index: 1, kind: input, shape index: {}]   ;;  %s2448_s0 = inlined_call_operand.vmem [shape: bf16[256,256], index: 0, kind: input, shape index: {}]   ;;  %s2449_s2 = inlined_call_operand.vmem [shape: bf16[128,128], index: 2, kind: input, shape index: {}]   ;;  %s2450_s3 = inlined_call_operand.vmem [shape: f32[1,128], index: 3, kind: input, shape index: {}]   ;;  %s2451_s4 = inlined_call_operand.vmem [shape: f32[256,128], index: 4, kind: output, shape index: {}]  }
   0x1   :  { %v1562_v0 = vld [vmem:[%s2447_s1 + $0x40] sm:$0xff]   ;;  %v1564_v2 = vld [vmem:[%s2447_s1 + $0x48] sm:$0xff]   ;;  %v1566_v4 = vld [vmem:[%s2447_s1 + $0x50] sm:$0xff]  }
   0x2   :  { %v1563_v1 = vld [vmem:[%s2447_s1] sm:$0xff]   ;;  %1362 = vmatprep.subr.bf16.mxu0 %v1562_v0  ;;  %1546 = vmatprep.subr.bf16.mxu1 %v1562_v0  ;;  %v1565_v3 = vld [vmem:[%s2447_s1 + $0x8] sm:$0xff]   ;;  %v1567_v5 = vld [vmem:[%s2447_s1 + $0x10] sm:$0xff]  }
   0x3   :  { %1363 = vmatpush3.bf16.msra.mxu0 %v1563_v1  ;;  %1554 = vmatpush3.bf16.msra.mxu1 %v1563_v1  ;;  %v1568_v6 = vld [vmem:[%s2447_s1 + $0x58] sm:$0xff]   ;;  %v1570_v8 = vld [vmem:[%s2447_s1 + $0x60] sm:$0xff]   ;;  %v1572_v10 = vld [vmem:[%s2447_s1 + $0x68] sm:$0xff]  }
   0x4   :  { %1364 = vmatprep.subr.bf16.mxu0 %v1564_v2  ;;  %1547 = vmatprep.subr.bf16.mxu1 %v1564_v2  ;;  %v1569_v7 = vld [vmem:[%s2447_s1 + $0x18] sm:$0xff]   ;;  %v1571_v9 = vld [vmem:[%s2447_s1 + $0x20] sm:$0xff]   ;;  %v1573_v12 = vld [vmem:[%s2447_s1 + $0x28] sm:$0xff]  }
   0x5   :  { %v1580_v11 = vld [vmem:[%s2448_s0 + $0x4] ss:$8 sps:$4 sm:$0xff]   ;;  %v1574_v13 = vld [vmem:[%s2447_s1 + $0x70] sm:$0xff]   ;;  %v1576_v15 = vld [vmem:[%s2447_s1 + $0x78] sm:$0xff]  }
   0x6   :  { %438 = vmatprep.mubr.bf16.mxu0 %v1580_v11  ;;  %v1575_v14 = vld [vmem:[%s2447_s1 + $0x30] sm:$0xff]   ;;  %v1577_v16 = vld [vmem:[%s2447_s1 + $0x38] sm:$0xff]   ;;  %v1578_v17 = vld [vmem:[%s2448_s0] ss:$8 sps:$4 sm:$0xff]  }
   0x7   :  { %1365 = vmatpush3.bf16.msra.mxu0 %v1565_v3  ;;  %1555 = vmatpush3.bf16.msra.mxu1 %v1565_v3  ;;  %v1610_v18 = vld [vmem:[%s2448_s0 + $0xc4] ss:$8 sps:$4 sm:$0xff]   ;;  %v1581_v19 = vld [vmem:[%s2448_s0 + $0x14] ss:$8 sps:$4 sm:$0xff]   ;;  %v1608_v20 = vld [vmem:[%s2448_s0 + $0xc0] ss:$8 sps:$4 sm:$0xff]  }
   0x8   :  { %1366 = vmatprep.subr.bf16.mxu0 %v1566_v4  ;;  %1548 = vmatprep.subr.bf16.mxu1 %v1566_v4  ;;  %v1614_v21 = vld [vmem:[%s2448_s0 + $0xd4] ss:$8 sps:$4 sm:$0xff]   ;;  %v1583_v22 = vld [vmem:[%s2448_s0 + $0x10] ss:$8 sps:$4 sm:$0xff]   ;;  %v1584_v23 = vld [vmem:[%s2448_s0 + $0x24] ss:$8 sps:$4 sm:$0xff]  }
   0x9   :  { %534 = vmatprep.mubr.bf16.mxu1 %v1610_v18  ;;  %v1616_v24 = vld [vmem:[%s2448_s0 + $0xd0] ss:$8 sps:$4 sm:$0xff]   ;;  %v1626_v25 = vld [vmem:[%s2449_s2] sm:$0xff]   ;;  %v1627_v26 = vld [vmem:[%s2449_s2 + $0x8] sm:$0xff]  }
   0xa   :  { %v1620_v27 = vld [vmem:[%s2448_s0 + $0xe4] ss:$8 sps:$4 sm:$0xff]   ;;  %v1628_v28 = vld [vmem:[%s2449_s2 + $0x10] sm:$0xff]   ;;  %v1586_v29 = vld [vmem:[%s2448_s0 + $0x20] ss:$8 sps:$4 sm:$0xff]  }
   0xb   :  { %1367 = vmatpush3.bf16.msra.mxu0 %v1567_v5  ;;  %1556 = vmatpush3.bf16.msra.mxu1 %v1567_v5  ;;  %v1629_v30 = vld [vmem:[%s2449_s2 + $0x18] sm:$0xff]   ;;  %v1622_v32 = vld [vmem:[%s2448_s0 + $0xe0] ss:$8 sps:$4 sm:$0xff]   ;;  %v1590_v35 = vld [vmem:[%s2448_s0 + $0x44] ss:$8 sps:$4 sm:$0xff]  }
   0xc   :  { %1368 = vmatprep.subr.bf16.mxu0 %v1568_v6  ;;  %1549 = vmatprep.subr.bf16.mxu1 %v1568_v6  ;;  %v1587_v31 = vld [vmem:[%s2448_s0 + $0x34] ss:$8 sps:$4 sm:$0xff]   ;;  %v1589_v34 = vld [vmem:[%s2448_s0 + $0x30] ss:$8 sps:$4 sm:$0xff]   ;;  %v1592_v37 = vld [vmem:[%s2448_s0 + $0x40] ss:$8 sps:$4 sm:$0xff]  }
   0xd   :  { %v1623_v33 = vld [vmem:[%s2448_s0 + $0xf4] ss:$8 sps:$4 sm:$0xff]   ;;  %v1625_v36 = vld [vmem:[%s2448_s0 + $0xf0] ss:$8 sps:$4 sm:$0xff]   ;;  %v1596_v40 = vld [vmem:[%s2448_s0 + $0x64] ss:$8 sps:$4 sm:$0xff]  }
   0xe   :  { %v1593_v38 = vld [vmem:[%s2448_s0 + $0x54] ss:$8 sps:$4 sm:$0xff]   ;;  %v1595_v39 = vld [vmem:[%s2448_s0 + $0x50] ss:$8 sps:$4 sm:$0xff]   ;;  %v1598_v41 = vld [vmem:[%s2448_s0 + $0x60] ss:$8 sps:$4 sm:$0xff]  }
   0xf   :  { %1369 = vmatpush3.bf16.msra.mxu0 %v1569_v7  ;;  %1557 = vmatpush3.bf16.msra.mxu1 %v1569_v7  ;;  %v1599_v42 = vld [vmem:[%s2448_s0 + $0x74] ss:$8 sps:$4 sm:$0xff]   ;;  %v1601_v43 = vld [vmem:[%s2448_s0 + $0x70] ss:$8 sps:$4 sm:$0xff]   ;;  %v1602_v44 = vld [vmem:[%s2448_s0 + $0x84] ss:$8 sps:$4 sm:$0xff]  }
  0x10   :  { %1370 = vmatprep.subr.bf16.mxu0 %v1570_v8  ;;  %1550 = vmatprep.subr.bf16.mxu1 %v1570_v8  ;;  %v1604_v45 = vld [vmem:[%s2448_s0 + $0x80] ss:$8 sps:$4 sm:$0xff]   ;;  %v1605_v46 = vld [vmem:[%s2448_s0 + $0x94] ss:$8 sps:$4 sm:$0xff]   ;;  %v1607_v47 = vld [vmem:[%s2448_s0 + $0x90] ss:$8 sps:$4 sm:$0xff]  }
  0x11   :  { %v1611_v48 = vld [vmem:[%s2448_s0 + $0xa4] ss:$8 sps:$4 sm:$0xff]   ;;  %v1613_v49 = vld [vmem:[%s2448_s0 + $0xa0] ss:$8 sps:$4 sm:$0xff]   ;;  %v1617_v50 = vld [vmem:[%s2448_s0 + $0xb4] ss:$8 sps:$4 sm:$0xff]  }
  0x12   :  { %v1630_v51 = vld [vmem:[%s2449_s2 + $0x20] sm:$0xff]   ;;  %v1619_v52 = vld [vmem:[%s2448_s0 + $0xb0] ss:$8 sps:$4 sm:$0xff]   ;;  %v1631_v53 = vld [vmem:[%s2449_s2 + $0x28] sm:$0xff]  }
  0x13   :  { %1371 = vmatpush3.bf16.msra.mxu0 %v1571_v9  ;;  %1558 = vmatpush3.bf16.msra.mxu1 %v1571_v9  ;;  %v1632_v54 = vld [vmem:[%s2449_s2 + $0x30] sm:$0xff]   ;;  %v1633_v55 = vld [vmem:[%s2449_s2 + $0x38] sm:$0xff]  }
  0x14   :  { %1372 = vmatprep.subr.bf16.mxu0 %v1572_v10  ;;  %1551 = vmatprep.subr.bf16.mxu1 %v1572_v10 }
  0x17   :  { %1373 = vmatpush3.bf16.msra.mxu0 %v1573_v12  ;;  %1559 = vmatpush3.bf16.msra.mxu1 %v1573_v12 }
  0x18   :  { %1374 = vmatprep.subr.bf16.mxu0 %v1574_v13  ;;  %1552 = vmatprep.subr.bf16.mxu1 %v1574_v13 }
  0x1b   :  { %1375 = vmatpush3.bf16.msra.mxu0 %v1575_v14  ;;  %1560 = vmatpush3.bf16.msra.mxu1 %v1575_v14 }
  0x1c   :  { %1376 = vmatprep.subr.bf16.mxu0 %v1576_v15  ;;  %1553 = vmatprep.subr.bf16.mxu1 %v1576_v15 }
  0x1f   :  { %1377 = vmatpush3.bf16.msra.mxu0 %v1577_v16  ;;  %1561 = vmatpush3.bf16.msra.mxu1 %v1577_v16 }
  0x20   :  { %1498 = vmatprep.subr.bf16.mxu1 %v1626_v25 }
  0x22   :  { %439 = vmatmul.mubr.bf16.vlgmr.msra.gmra.mrb[0].mxu0 %v1578_v17  ;;  %535 = vmatmul.mubr.bf16.vlgmr.msra.gmra.mrb[0].mxu1 %v1608_v20 }
  0x23   :  { %446 = vmatprep.mubr.bf16.mxu0 %v1581_v19  ;;  %542 = vmatprep.mubr.bf16.mxu1 %v1614_v21 }
  0x24   :  { %1499 = vmatpush3.bf16.msra.mxu1 %v1626_v25 }
  0x25   :  { %1500 = vmatprep.subr.bf16.mxu1 %v1627_v26 }
  0x28   :  { %1501 = vmatpush3.bf16.msra.mxu1 %v1627_v26 }
  0x29   :  { %1502 = vmatprep.subr.bf16.mxu1 %v1628_v28 }
  0x2a   :  { %447 = vmatmul.mubr.bf16.gmra.mrb[4].mxu0 %v1583_v22  ;;  %543 = vmatmul.mubr.bf16.gmra.mrb[4].mxu1 %v1616_v24 }
  0x2b   :  { %454 = vmatprep.mubr.bf16.mxu0 %v1584_v23  ;;  %550 = vmatprep.mubr.bf16.mxu1 %v1620_v27 }
  0x2c   :  { %1503 = vmatpush3.bf16.msra.mxu1 %v1628_v28 }
  0x2d   :  { %1504 = vmatprep.subr.bf16.mxu1 %v1629_v30 }
  0x30   :  { %1505 = vmatpush3.bf16.msra.mxu1 %v1629_v30 }
  0x31   :  { %1506 = vmatprep.subr.bf16.mxu1 %v1630_v51 }
  0x32   :  { %455 = vmatmul.mubr.bf16.gmra.mrb[8].mxu0 %v1586_v29  ;;  %551 = vmatmul.mubr.bf16.gmra.mrb[8].mxu1 %v1622_v32 }
  0x33   :  { %462 = vmatprep.mubr.bf16.mxu0 %v1587_v31  ;;  %558 = vmatprep.mubr.bf16.mxu1 %v1623_v33 }
  0x34   :  { %1507 = vmatpush3.bf16.msra.mxu1 %v1630_v51 }
  0x35   :  { %1508 = vmatprep.subr.bf16.mxu1 %v1631_v53 }
  0x38   :  { %1509 = vmatpush3.bf16.msra.mxu1 %v1631_v53 }
  0x39   :  { %1510 = vmatprep.subr.bf16.mxu1 %v1632_v54 }
  0x3a   :  { %463 = vmatmul.mubr.bf16.gmra.mrb[12].mxu0 %v1589_v34  ;;  %559 = vmatmul.mubr.bf16.gmra.mrb[12].mxu1 %v1625_v36 }
  0x3b   :  { %470 = vmatprep.mubr.bf16.mxu0 %v1590_v35 }
  0x3c   :  { %1511 = vmatpush3.bf16.msra.mxu1 %v1632_v54 }
  0x3d   :  { %1512 = vmatprep.subr.bf16.mxu1 %v1633_v55 }
  0x40   :  { %1513 = vmatpush3.bf16.msra.mxu1 %v1633_v55 }
  0x42   :  { %471 = vmatmul.mubr.bf16.gmra.mrb[16].mxu0 %v1592_v37 }
  0x43   :  { %478 = vmatprep.mubr.bf16.mxu0 %v1593_v38 }
  0x4a   :  { %479 = vmatmul.mubr.bf16.gmra.mrb[20].mxu0 %v1595_v39 }
  0x4b   :  { %486 = vmatprep.mubr.bf16.mxu0 %v1596_v40 }
  0x52   :  { %487 = vmatmul.mubr.bf16.gmra.mrb[24].mxu0 %v1598_v41 }
  0x53   :  { %494 = vmatprep.mubr.bf16.mxu0 %v1599_v42 }
  0x5a   :  { %495 = vmatmul.mubr.bf16.gmra.mrb[28].mxu0 %v1601_v43 }
  0x5b   :  { %502 = vmatprep.mubr.bf16.mxu0 %v1602_v44 }
  0x62   :  { %503 = vmatmul.mubr.bf16.gmra.mrb[32].mxu0 %v1604_v45 }
  0x63   :  { %510 = vmatprep.mubr.bf16.mxu0 %v1605_v46 }
  0x6a   :  { %511 = vmatmul.mubr.bf16.gmra.mrb[36].mxu0 %v1607_v47 }
  0x6b   :  { %518 = vmatprep.mubr.bf16.mxu0 %v1611_v48 }
  0x72   :  { %519 = vmatmul.mubr.bf16.gmra.mrb[40].mxu0 %v1613_v49 }
  0x73   :  { %526 = vmatprep.mubr.bf16.mxu0 %v1617_v50 }
  0x7a   :  { %527 = vmatmul.mubr.bf16.gmra.mrb[44].mxu0 %v1619_v52 }
  0xf5   :  { %v1378_v56 = vpop.f32.mrb[0].mxu0  ;;  %v1450_v58 = vpop.f32.mrb[0].mxu1 }
  0xf6   :  { %v1379_v57 = vpop.f32.mrb[1].mxu0  ;;  %v1451_v61 = vpop.f32.mrb[1].mxu1 }
  0xf7   :  { %v1380_v59 = vadd.f32 %v1379_v57, %v1378_v56  ;;  %v1381_v60 = vpop.f32.mrb[2].mxu0  ;;  %v1955_v63 = vadd.f32 %v1451_v61, %v1450_v58  ;;  %v1453_v0 = vpop.f32.mrb[2].mxu1 }
  0xf8   :  { %v1382_v62 = vpop.f32.mrb[3].mxu0  ;;  %v1454_v2 = vpop.f32.mrb[3].mxu1 }
  0xf9   :  { %v1383_v1 = vadd.f32 %v1382_v62, %v1381_v60  ;;  %v1957_v3 = vadd.f32 %v1454_v2, %v1453_v0 }
  0xfb   :  { %v666_v4 = vpack.c.bf16 %v1383_v1, %v1380_v59  ;;  %v678_v5 = vpack.c.bf16 %v1957_v3, %v1955_v63  ;;  %v1996_v63 = vld [vmem:[%s2450_s3] ss:$0 sm:$0xff] }
  0xfd   :  { %v1384_v6 = vpop.f32.mrb[4].mxu0  ;;  %1514 = vmatprep.mubr.bf16.mxu1 %v666_v4  ;;  %v1456_v8 = vpop.f32.mrb[4].mxu1 }
  0xfe   :  { %v1385_v7 = vpop.f32.mrb[5].mxu0  ;;  %v1457_v11 = vpop.f32.mrb[5].mxu1 }
  0xff   :  { %v1386_v9 = vadd.f32 %v1385_v7, %v1384_v6  ;;  %v1387_v10 = vpop.f32.mrb[6].mxu0  ;;  %v1961_v13 = vadd.f32 %v1457_v11, %v1456_v8  ;;  %v1459_v14 = vpop.f32.mrb[6].mxu1 }
 0x100   :  { %v1388_v12 = vpop.f32.mrb[7].mxu0  ;;  %v1460_v16 = vpop.f32.mrb[7].mxu1 }
 0x101   :  { %v1389_v15 = vadd.f32 %v1388_v12, %v1387_v10  ;;  %v1963_v17 = vadd.f32 %v1460_v16, %v1459_v14 }
 0x103   :  { %v667_v18 = vpack.c.bf16 %v1389_v15, %v1386_v9  ;;  %v679_v19 = vpack.c.bf16 %v1963_v17, %v1961_v13 }
 0x105   :  { %v1390_v20 = vpop.f32.mrb[8].mxu0  ;;  %1515 = vmatmul.mubr.bf16.vlgmr.msra.gmra.mrb[16].mxu1 %v667_v18  ;;  %v1462_v22 = vpop.f32.mrb[8].mxu1 }
 0x106   :  { %v1391_v21 = vpop.f32.mrb[9].mxu0  ;;  %v1463_v25 = vpop.f32.mrb[9].mxu1 }
 0x107   :  { %v1392_v23 = vadd.f32 %v1391_v21, %v1390_v20  ;;  %v1393_v24 = vpop.f32.mrb[10].mxu0  ;;  %v1967_v27 = vadd.f32 %v1463_v25, %v1462_v22  ;;  %v1465_v28 = vpop.f32.mrb[10].mxu1 }
 0x108   :  { %v1394_v26 = vpop.f32.mrb[11].mxu0  ;;  %v1466_v30 = vpop.f32.mrb[11].mxu1 }
 0x109   :  { %v1395_v29 = vadd.f32 %v1394_v26, %v1393_v24  ;;  %v1969_v31 = vadd.f32 %v1466_v30, %v1465_v28 }
 0x10b   :  { %v668_v32 = vpack.c.bf16 %v1395_v29, %v1392_v23  ;;  %v680_v33 = vpack.c.bf16 %v1969_v31, %v1967_v27 }
 0x10d   :  { %v1396_v34 = vpop.f32.mrb[12].mxu0  ;;  %1518 = vmatprep.mubr.bf16.mxu1 %v668_v32  ;;  %v1468_v36 = vpop.f32.mrb[12].mxu1 }
 0x10e   :  { %v1397_v35 = vpop.f32.mrb[13].mxu0  ;;  %v1469_v39 = vpop.f32.mrb[13].mxu1 }
 0x10f   :  { %v1398_v37 = vadd.f32 %v1397_v35, %v1396_v34  ;;  %v1399_v38 = vpop.f32.mrb[14].mxu0  ;;  %v1973_v41 = vadd.f32 %v1469_v39, %v1468_v36  ;;  %v1471_v42 = vpop.f32.mrb[14].mxu1 }
 0x110   :  { %v1400_v40 = vpop.f32.mrb[15].mxu0  ;;  %v1472_v44 = vpop.f32.mrb[15].mxu1 }
 0x111   :  { %v1401_v43 = vadd.f32 %v1400_v40, %v1399_v38  ;;  %v1975_v45 = vadd.f32 %v1472_v44, %v1471_v42 }
 0x113   :  { %v669_v46 = vpack.c.bf16 %v1401_v43, %v1398_v37  ;;  %v681_v47 = vpack.c.bf16 %v1975_v45, %v1973_v41 }
 0x115   :  { %v1402_v48 = vpop.f32.mrb[16].mxu0  ;;  %1519 = vmatmul.mubr.bf16.gmra.mrb[20].mxu1 %v669_v46 }
 0x116   :  { %v1403_v49 = vpop.f32.mrb[17].mxu0 }
 0x117   :  { %v1404_v50 = vadd.f32 %v1403_v49, %v1402_v48  ;;  %v1405_v51 = vpop.f32.mrb[18].mxu0 }
 0x118   :  { %v1406_v52 = vpop.f32.mrb[19].mxu0 }
 0x119   :  { %v1407_v53 = vadd.f32 %v1406_v52, %v1405_v51  ;;  %v914_v52 = vlaneseq }
 0x11b   :  { %v670_v54 = vpack.c.bf16 %v1407_v53, %v1404_v50  ;;  %v1991_v53 = vand.u32 127, %v914_v52 }
 0x11d   :  { %v1408_v55 = vpop.f32.mrb[20].mxu0  ;;  %1522 = vmatprep.mubr.bf16.mxu1 %v670_v54  ;;  %vm916_vm0 = vcmp.lt.s32.totalorder %v1991_v53, 4 }
 0x11e   :  { %v1409_v56 = vpop.f32.mrb[21].mxu0 }
 0x11f   :  { %v1410_v57 = vadd.f32 %v1409_v56, %v1408_v55  ;;  %v1411_v58 = vpop.f32.mrb[22].mxu0 }
 0x120   :  { %v1412_v59 = vpop.f32.mrb[23].mxu0 }
 0x121   :  { %v1413_v60 = vadd.f32 %v1412_v59, %v1411_v58 }
 0x123   :  { %v671_v61 = vpack.c.bf16 %v1413_v60, %v1410_v57 }
 0x125   :  { %v1414_v62 = vpop.f32.mrb[24].mxu0  ;;  %1523 = vmatmul.mubr.bf16.gmra.mrb[24].mxu1 %v671_v61 }
 0x126   :  { %v1415_v0 = vpop.f32.mrb[25].mxu0 }
 0x127   :  { %v1416_v1 = vadd.f32 %v1415_v0, %v1414_v62  ;;  %v1417_v2 = vpop.f32.mrb[26].mxu0 }
 0x128   :  { %v1418_v4 = vpop.f32.mrb[27].mxu0 }
 0x129   :  { %v1419_v6 = vadd.f32 %v1418_v4, %v1417_v2 }
 0x12b   :  { %v672_v7 = vpack.c.bf16 %v1419_v6, %v1416_v1 }
 0x12d   :  { %v1420_v8 = vpop.f32.mrb[28].mxu0  ;;  %1526 = vmatprep.mubr.bf16.mxu1 %v672_v7 }
 0x12e   :  { %v1421_v9 = vpop.f32.mrb[29].mxu0 }
 0x12f   :  { %v1422_v10 = vadd.f32 %v1421_v9, %v1420_v8  ;;  %v1423_v11 = vpop.f32.mrb[30].mxu0 }
 0x130   :  { %v1424_v12 = vpop.f32.mrb[31].mxu0 }
 0x131   :  { %v1425_v14 = vadd.f32 %v1424_v12, %v1423_v11 }
 0x133   :  { %v673_v15 = vpack.c.bf16 %v1425_v14, %v1422_v10 }
 0x135   :  { %v1426_v16 = vpop.f32.mrb[32].mxu0  ;;  %1527 = vmatmul.mubr.bf16.gmra.mrb[28].mxu1 %v673_v15 }
 0x136   :  { %v1427_v18 = vpop.f32.mrb[33].mxu0 }
 0x137   :  { %v1428_v20 = vadd.f32 %v1427_v18, %v1426_v16  ;;  %v1429_v21 = vpop.f32.mrb[34].mxu0 }
 0x138   :  { %v1430_v22 = vpop.f32.mrb[35].mxu0 }
 0x139   :  { %v1431_v23 = vadd.f32 %v1430_v22, %v1429_v21 }
 0x13b   :  { %v674_v24 = vpack.c.bf16 %v1431_v23, %v1428_v20 }
 0x13d   :  { %v1432_v25 = vpop.f32.mrb[36].mxu0  ;;  %1530 = vmatprep.mubr.bf16.mxu1 %v674_v24 }
 0x13e   :  { %v1433_v26 = vpop.f32.mrb[37].mxu0 }
 0x13f   :  { %v1434_v28 = vadd.f32 %v1433_v26, %v1432_v25  ;;  %v1435_v29 = vpop.f32.mrb[38].mxu0 }
 0x140   :  { %v1436_v30 = vpop.f32.mrb[39].mxu0 }
 0x141   :  { %v1437_v32 = vadd.f32 %v1436_v30, %v1435_v29 }
 0x143   :  { %v675_v34 = vpack.c.bf16 %v1437_v32, %v1434_v28 }
 0x145   :  { %v1438_v35 = vpop.f32.mrb[40].mxu0  ;;  %1531 = vmatmul.mubr.bf16.gmra.mrb[32].mxu1 %v675_v34 }
 0x146   :  { %v1439_v36 = vpop.f32.mrb[41].mxu0 }
 0x147   :  { %v1440_v37 = vadd.f32 %v1439_v36, %v1438_v35  ;;  %v1441_v38 = vpop.f32.mrb[42].mxu0 }
 0x148   :  { %v1442_v39 = vpop.f32.mrb[43].mxu0 }
 0x149   :  { %v1443_v40 = vadd.f32 %v1442_v39, %v1441_v38 }
 0x14b   :  { %v676_v42 = vpack.c.bf16 %v1443_v40, %v1440_v37 }
 0x14d   :  { %v1444_v43 = vpop.f32.mrb[44].mxu0  ;;  %1534 = vmatprep.mubr.bf16.mxu1 %v676_v42 }
 0x14e   :  { %v1445_v44 = vpop.f32.mrb[45].mxu0 }
 0x14f   :  { %v1446_v46 = vadd.f32 %v1445_v44, %v1444_v43  ;;  %v1447_v48 = vpop.f32.mrb[46].mxu0 }
 0x150   :  { %v1448_v49 = vpop.f32.mrb[47].mxu0 }
 0x151   :  { %v1449_v50 = vadd.f32 %v1448_v49, %v1447_v48 }
 0x153   :  { %v677_v51 = vpack.c.bf16 %v1449_v50, %v1446_v46 }
 0x155   :  { %1535 = vmatmul.mubr.bf16.gmra.mrb[36].mxu1 %v677_v51 }
 0x156   :  { %1538 = vmatprep.mubr.bf16.mxu1 %v678_v5 }
 0x15d   :  { %1539 = vmatmul.mubr.bf16.gmra.mrb[40].mxu1 %v679_v19 }
 0x15e   :  { %1542 = vmatprep.mubr.bf16.mxu1 %v680_v33 }
 0x165   :  { %1543 = vmatmul.mubr.bf16.gmra.mrb[44].mxu1 %v681_v47 }
 0x1d8   :  { %v1516_v3 = vpop.f32.mrb[16].mxu1 }
 0x1d9   :  { %v796_v5 = vadd.f32 %v1516_v3, %v1996_v63  ;;  %v787_v13 = vpop.f32.mrb[17].mxu1 }
 0x1da   :  { %v788_v17 = vadd.f32 %v1996_v63, %v787_v13  ;;  %v1517_v19 = vpop.f32.mrb[18].mxu1 }
 0x1db   :  { %v799_v27 = vadd.f32 %v1517_v19, %v1996_v63  ;;  %v790_v31 = vpop.f32.mrb[19].mxu1  ;;  %v2004_v33 = vsel %vm916_vm0, %v796_v5, -1e+30 }
 0x1dc   :  { %v791_v41 = vadd.f32 %v1996_v63, %v790_v31  ;;  %953 = vmax.xlane.f32.xlu1 %v2004_v33  ;;  %v2010_v45 = vsel %vm916_vm0, %v788_v17, -1e+30 }
 0x1dd   :  { %949 = vmax.xlane.f32.xlu0 %v2010_v45  ;;  %v2015_v47 = vsel %vm916_vm0, %v799_v27, -1e+30 }
 0x1de   :  { %v2020_v54 = vsel %vm916_vm0, %v791_v41, -1e+30 }
 0x1e0   :  { %955 = vmax.xlane.f32.xlu1 %v2015_v47 }
 0x1e1   :  { %951 = vmax.xlane.f32.xlu0 %v2020_v54 }
 0x1e8   :  { %v1520_v55 = vpop.f32.mrb[20].mxu1 }
 0x1e9   :  { %v812_v56 = vadd.f32 %v1520_v55, %v1996_v63  ;;  %v803_v57 = vpop.f32.mrb[21].mxu1 }
 0x1ea   :  { %v1521_v58 = vpop.f32.mrb[22].mxu1  ;;  %v804_v59 = vadd.f32 %v1996_v63, %v803_v57 }
 0x1eb   :  { %v815_v60 = vadd.f32 %v1521_v58, %v1996_v63  ;;  %v806_v61 = vpop.f32.mrb[23].mxu1  ;;  %v2028_v62 = vsel %vm916_vm0, %v812_v56, -1e+30 }
 0x1ec   :  { %961 = vmax.xlane.f32.xlu0 %v2028_v62  ;;  %v807_v0 = vadd.f32 %v1996_v63, %v806_v61  ;;  %v2039_v2 = vsel %vm916_vm0, %v804_v59, -1e+30 }
 0x1ed   :  { %v2034_v1 = vsel %vm916_vm0, %v815_v60, -1e+30 }
 0x1ee   :  { %963 = vmax.xlane.f32.xlu1 %v2034_v1  ;;  %v2044_v4 = vsel %vm916_vm0, %v807_v0, -1e+30 }
 0x1f0   :  { %957 = vmax.xlane.f32.xlu0 %v2039_v2 }
 0x1f2   :  { %959 = vmax.xlane.f32.xlu1 %v2044_v4 }
 0x1f8   :  { %v1524_v6 = vpop.f32.mrb[24].mxu1 }
 0x1f9   :  { %v828_v7 = vadd.f32 %v1524_v6, %v1996_v63  ;;  %v819_v8 = vpop.f32.mrb[25].mxu1 }
 0x1fa   :  { %v1525_v9 = vpop.f32.mrb[26].mxu1  ;;  %v820_v10 = vadd.f32 %v1996_v63, %v819_v8 }
 0x1fb   :  { %v831_v11 = vadd.f32 %v1525_v9, %v1996_v63  ;;  %v822_v12 = vpop.f32.mrb[27].mxu1  ;;  %v2052_v14 = vsel %vm916_vm0, %v828_v7, -1e+30 }
 0x1fc   :  { %969 = vmax.xlane.f32.xlu0 %v2052_v14  ;;  %v823_v15 = vadd.f32 %v1996_v63, %v822_v12  ;;  %v2063_v18 = vsel %vm916_vm0, %v820_v10, -1e+30 }
 0x1fd   :  { %v2058_v16 = vsel %vm916_vm0, %v831_v11, -1e+30 }
 0x1fe   :  { %971 = vmax.xlane.f32.xlu1 %v2058_v16  ;;  %v2068_v20 = vsel %vm916_vm0, %v823_v15, -1e+30 }
 0x200   :  { %965 = vmax.xlane.f32.xlu0 %v2063_v18 }
 0x202   :  { %967 = vmax.xlane.f32.xlu1 %v2068_v20 }
 0x208   :  { %v1528_v21 = vpop.f32.mrb[28].mxu1 }
 0x209   :  { %v844_v22 = vadd.f32 %v1528_v21, %v1996_v63  ;;  %v835_v23 = vpop.f32.mrb[29].mxu1 }
 0x20a   :  { %v1529_v24 = vpop.f32.mrb[30].mxu1  ;;  %v836_v25 = vadd.f32 %v1996_v63, %v835_v23 }
 0x20b   :  { %v847_v26 = vadd.f32 %v1529_v24, %v1996_v63  ;;  %v838_v28 = vpop.f32.mrb[31].mxu1  ;;  %v2076_v29 = vsel %vm916_vm0, %v844_v22, -1e+30 }
 0x20c   :  { %977 = vmax.xlane.f32.xlu0 %v2076_v29  ;;  %v839_v30 = vadd.f32 %v1996_v63, %v838_v28  ;;  %v2087_v34 = vsel %vm916_vm0, %v836_v25, -1e+30 }
 0x20d   :  { %v2082_v32 = vsel %vm916_vm0, %v847_v26, -1e+30 }
 0x20e   :  { %979 = vmax.xlane.f32.xlu1 %v2082_v32  ;;  %v2092_v35 = vsel %vm916_vm0, %v839_v30, -1e+30 }
 0x210   :  { %973 = vmax.xlane.f32.xlu0 %v2087_v34 }
 0x212   :  { %975 = vmax.xlane.f32.xlu1 %v2092_v35 }
 0x218   :  { %v1532_v36 = vpop.f32.mrb[32].mxu1 }
 0x219   :  { %v860_v37 = vadd.f32 %v1532_v36, %v1996_v63  ;;  %v851_v38 = vpop.f32.mrb[33].mxu1 }
 0x21a   :  { %v1533_v39 = vpop.f32.mrb[34].mxu1  ;;  %v852_v40 = vadd.f32 %v1996_v63, %v851_v38 }
 0x21b   :  { %v863_v42 = vadd.f32 %v1533_v39, %v1996_v63  ;;  %v854_v43 = vpop.f32.mrb[35].mxu1  ;;  %v2100_v44 = vsel %vm916_vm0, %v860_v37, -1e+30 }
 0x21c   :  { %985 = vmax.xlane.f32.xlu0 %v2100_v44  ;;  %v855_v46 = vadd.f32 %v1996_v63, %v854_v43  ;;  %v2111_v49 = vsel %vm916_vm0, %v852_v40, -1e+30 }
 0x21d   :  { %v2106_v48 = vsel %vm916_vm0, %v863_v42, -1e+30 }
 0x21e   :  { %987 = vmax.xlane.f32.xlu1 %v2106_v48  ;;  %v2116_v50 = vsel %vm916_vm0, %v855_v46, -1e+30 }
 0x220   :  { %981 = vmax.xlane.f32.xlu0 %v2111_v49 }
 0x222   :  { %983 = vmax.xlane.f32.xlu1 %v2116_v50 }
 0x228   :  { %v1536_v51 = vpop.f32.mrb[36].mxu1 }
 0x229   :  { %v876_v52 = vadd.f32 %v1536_v51, %v1996_v63  ;;  %v867_v3 = vpop.f32.mrb[37].mxu1 }
 0x22a   :  { %v1537_v5 = vpop.f32.mrb[38].mxu1  ;;  %v868_v13 = vadd.f32 %v1996_v63, %v867_v3 }
 0x22b   :  { %v879_v17 = vadd.f32 %v1537_v5, %v1996_v63  ;;  %v870_v19 = vpop.f32.mrb[39].mxu1  ;;  %v2124_v27 = vsel %vm916_vm0, %v876_v52, -1e+30 }
 0x22c   :  { %993 = vmax.xlane.f32.xlu0 %v2124_v27  ;;  %v871_v31 = vadd.f32 %v1996_v63, %v870_v19  ;;  %v2135_v55 = vsel %vm916_vm0, %v868_v13, -1e+30 }
 0x22d   :  { %v2130_v41 = vsel %vm916_vm0, %v879_v17, -1e+30 }
 0x22e   :  { %995 = vmax.xlane.f32.xlu1 %v2130_v41  ;;  %v2141_v59 = vsel %vm916_vm0, %v871_v31, -1e+30 }
 0x230   :  { %v1540_v56 = vpop.f32.mrb[40].mxu1  ;;  %989 = vmax.xlane.f32.xlu0 %v2135_v55 }
 0x231   :  { %v892_v57 = vadd.f32 %v1540_v56, %v1996_v63  ;;  %v883_v58 = vpop.f32.mrb[41].mxu1 }
 0x232   :  { %v1541_v60 = vpop.f32.mrb[42].mxu1  ;;  %991 = vmax.xlane.f32.xlu1 %v2141_v59  ;;  %v884_v61 = vadd.f32 %v1996_v63, %v883_v58 }
 0x233   :  { %v895_v0 = vadd.f32 %v1541_v60, %v1996_v63  ;;  %v886_v6 = vpop.f32.mrb[43].mxu1  ;;  %v2148_v7 = vsel %vm916_vm0, %v892_v57, -1e+30 }
 0x234   :  { %1001 = vmax.xlane.f32.xlu0 %v2148_v7  ;;  %v887_v8 = vadd.f32 %v1996_v63, %v886_v6  ;;  %v2159_v10 = vsel %vm916_vm0, %v884_v61, -1e+30 }
 0x235   :  { %v2154_v9 = vsel %vm916_vm0, %v895_v0, -1e+30 }
 0x236   :  { %1003 = vmax.xlane.f32.xlu1 %v2154_v9  ;;  %v2164_v15 = vsel %vm916_vm0, %v887_v8, -1e+30 }
 0x238   :  { %v1544_v11 = vpop.f32.mrb[44].mxu1  ;;  %997 = vmax.xlane.f32.xlu0 %v2159_v10 }
 0x239   :  { %v899_v12 = vpop.f32.mrb[45].mxu1  ;;  %v908_v24 = vadd.f32 %v1544_v11, %v1996_v63 }
 0x23a   :  { %v900_v21 = vadd.f32 %v1996_v63, %v899_v12  ;;  %v1545_v22 = vpop.f32.mrb[46].mxu1  ;;  %999 = vmax.xlane.f32.xlu1 %v2164_v15 }
 0x23b   :  { %v902_v23 = vpop.f32.mrb[47].mxu1  ;;  %v911_v28 = vadd.f32 %v1545_v22, %v1996_v63  ;;  %v2183_v36 = vsel %vm916_vm0, %v908_v24, -1e+30 }
 0x23c   :  { %v903_v25 = vadd.f32 %v1996_v63, %v902_v23  ;;  %v2172_v26 = vsel %vm916_vm0, %v900_v21, -1e+30 }
 0x23d   :  { %1005 = vmax.xlane.f32.xlu0 %v2172_v26  ;;  %v2188_v37 = vsel %vm916_vm0, %v911_v28, -1e+30 }
 0x23e   :  { %v2178_v30 = vsel %vm916_vm0, %v903_v25, -1e+30 }
 0x23f   :  { %1007 = vmax.xlane.f32.xlu1 %v2178_v30 }
 0x241   :  { %1009 = vmax.xlane.f32.xlu0 %v2183_v36 }
 0x243   :  { %1011 = vmax.xlane.f32.xlu1 %v2188_v37 }
 0x269   :  { %v954_v38 = vpop.xlane.xlu1 %953 }
 0x26a   :  { %v2192_v63 = vsub.f32 %v2004_v33, %v954_v38  ;;  %v950_v39 = vpop.xlane.xlu0 %949 }
 0x26b   :  { %v2195_v40 = vsub.f32 %v2010_v45, %v950_v39 }
 0x26c   :  { %v1049_v42 = vmul.f32 1.442695, %v2192_v63 }
 0x26d   :  { %v1045_v43 = vmul.f32 1.442695, %v2195_v40  ;;  %v956_v46 = vpop.xlane.xlu1 %955 }
 0x26e   :  { %1634 = vpow2.f32 %v1049_v42  ;;  %v2200_v53 = vsub.f32 %v2015_v47, %v956_v46  ;;  %v952_v51 = vpop.xlane.xlu0 %951 }
 0x26f   :  { %v2203_v52 = vsub.f32 %v2020_v54, %v952_v51  ;;  %1636 = vpow2.f32 %v1045_v43 }
 0x270   :  { %v1051_v33 = vmul.f32 1.442695, %v2200_v53 }
 0x271   :  { %v1047_v45 = vmul.f32 1.442695, %v2203_v52 }
 0x272   :  { %1638 = vpow2.f32 %v1051_v33 }
 0x273   :  { %1640 = vpow2.f32 %v1047_v45 }
 0x278   :  { %v1635_v3 = vpop.eup %1634 }
 0x279   :  { %1113 = vadd.xlane.f32.xlu0 %v1635_v3  ;;  %v962_v5 = vpop.xlane.xlu0 %961  ;;  %v1637_v17 = vpop.eup %1636 }
 0x27a   :  { %v2208_v13 = vsub.f32 %v2028_v62, %v962_v5 }
 0x27b   :  { %v964_v47 = vpop.xlane.xlu1 %963 }
 0x27c   :  { %v1639_v19 = vpop.eup %1638  ;;  %v1057_v31 = vmul.f32 1.442695, %v2208_v13  ;;  %v2212_v54 = vsub.f32 %v2034_v1, %v964_v47 }
 0x27d   :  { %1115 = vadd.xlane.f32.xlu1 %v1639_v19  ;;  %1109 = vadd.xlane.f32.xlu0 %v1637_v17  ;;  %v958_v56 = vpop.xlane.xlu0 %957  ;;  %v1641_v62 = vpop.eup %1640 }
 0x27e   :  { %1642 = vpow2.f32 %v1057_v31  ;;  %v1059_v57 = vmul.f32 1.442695, %v2212_v54  ;;  %v2216_v58 = vsub.f32 %v2039_v2, %v958_v56 }
 0x27f   :  { %v960_v60 = vpop.xlane.xlu1 %959 }
 0x280   :  { %1644 = vpow2.f32 %v1059_v57  ;;  %v1053_v61 = vmul.f32 1.442695, %v2216_v58  ;;  %v2220_v0 = vsub.f32 %v2044_v4, %v960_v60 }
 0x281   :  { %1111 = vadd.xlane.f32.xlu1 %v1641_v62 }
 0x282   :  { %1646 = vpow2.f32 %v1053_v61  ;;  %v1055_v1 = vmul.f32 1.442695, %v2220_v0 }
 0x284   :  { %1648 = vpow2.f32 %v1055_v1 }
 0x288   :  { %v1643_v6 = vpop.eup %1642 }
 0x289   :  { %1121 = vadd.xlane.f32.xlu0 %v1643_v6  ;;  %v970_v8 = vpop.xlane.xlu0 %969 }
 0x28a   :  { %v1645_v11 = vpop.eup %1644  ;;  %v2224_v2 = vsub.f32 %v2052_v14, %v970_v8 }
 0x28b   :  { %v972_v12 = vpop.xlane.xlu1 %971  ;;  %1123 = vadd.xlane.f32.xlu1 %v1645_v11 }
 0x28c   :  { %v1647_v21 = vpop.eup %1646  ;;  %v1065_v22 = vmul.f32 1.442695, %v2224_v2  ;;  %v2228_v4 = vsub.f32 %v2058_v16, %v972_v12 }
 0x28d   :  { %1117 = vadd.xlane.f32.xlu0 %v1647_v21  ;;  %v966_v23 = vpop.xlane.xlu0 %965 }
 0x28e   :  { %v1649_v24 = vpop.eup %1648  ;;  %1650 = vpow2.f32 %v1065_v22  ;;  %v1067_v25 = vmul.f32 1.442695, %v2228_v4  ;;  %v2232_v28 = vsub.f32 %v2063_v18, %v966_v23 }
 0x28f   :  { %v968_v38 = vpop.xlane.xlu1 %967  ;;  %1119 = vadd.xlane.f32.xlu1 %v1649_v24 }
 0x290   :  { %1652 = vpow2.f32 %v1067_v25  ;;  %v1061_v14 = vmul.f32 1.442695, %v2232_v28  ;;  %v2236_v39 = vsub.f32 %v2068_v20, %v968_v38 }
 0x292   :  { %1654 = vpow2.f32 %v1061_v14  ;;  %v1063_v16 = vmul.f32 1.442695, %v2236_v39 }
 0x294   :  { %1656 = vpow2.f32 %v1063_v16 }
 0x298   :  { %v1651_v42 = vpop.eup %1650 }
 0x299   :  { %1129 = vadd.xlane.f32.xlu0 %v1651_v42  ;;  %v978_v43 = vpop.xlane.xlu0 %977 }
 0x29a   :  { %v1653_v46 = vpop.eup %1652  ;;  %v2240_v51 = vsub.f32 %v2076_v29, %v978_v43 }
 0x29b   :  { %v980_v18 = vpop.xlane.xlu1 %979  ;;  %1131 = vadd.xlane.f32.xlu1 %v1653_v46 }
 0x29c   :  { %v1655_v33 = vpop.eup %1654  ;;  %v1073_v45 = vmul.f32 1.442695, %v2240_v51  ;;  %v2244_v3 = vsub.f32 %v2082_v32, %v980_v18 }
 0x29d   :  { %1125 = vadd.xlane.f32.xlu0 %v1655_v33  ;;  %v974_v20 = vpop.xlane.xlu0 %973 }
 0x29e   :  { %v1657_v5 = vpop.eup %1656  ;;  %1658 = vpow2.f32 %v1073_v45  ;;  %v1075_v17 = vmul.f32 1.442695, %v2244_v3  ;;  %v2248_v47 = vsub.f32 %v2087_v34, %v974_v20 }
 0x29f   :  { %v976_v19 = vpop.xlane.xlu1 %975  ;;  %1127 = vadd.xlane.f32.xlu1 %v1657_v5 }
 0x2a0   :  { %1660 = vpow2.f32 %v1075_v17  ;;  %v1069_v29 = vmul.f32 1.442695, %v2248_v47  ;;  %v2252_v31 = vsub.f32 %v2092_v35, %v976_v19 }
 0x2a2   :  { %1662 = vpow2.f32 %v1069_v29  ;;  %v1071_v32 = vmul.f32 1.442695, %v2252_v31 }
 0x2a4   :  { %1664 = vpow2.f32 %v1071_v32 }
 0x2a8   :  { %v1659_v56 = vpop.eup %1658 }
 0x2a9   :  { %1137 = vadd.xlane.f32.xlu0 %v1659_v56  ;;  %v986_v57 = vpop.xlane.xlu0 %985 }
 0x2aa   :  { %v1661_v60 = vpop.eup %1660  ;;  %v2256_v62 = vsub.f32 %v2100_v44, %v986_v57 }
 0x2ab   :  { %v988_v34 = vpop.xlane.xlu1 %987  ;;  %1139 = vadd.xlane.f32.xlu1 %v1661_v60 }
 0x2ac   :  { %v1663_v61 = vpop.eup %1662  ;;  %v1081_v1 = vmul.f32 1.442695, %v2256_v62  ;;  %v2260_v6 = vsub.f32 %v2106_v48, %v988_v34 }
 0x2ad   :  { %1133 = vadd.xlane.f32.xlu0 %v1663_v61  ;;  %v982_v35 = vpop.xlane.xlu0 %981 }
 0x2ae   :  { %v1665_v8 = vpop.eup %1664  ;;  %1666 = vpow2.f32 %v1081_v1  ;;  %v1083_v11 = vmul.f32 1.442695, %v2260_v6  ;;  %v2264_v12 = vsub.f32 %v2111_v49, %v982_v35 }
 0x2af   :  { %v984_v21 = vpop.xlane.xlu1 %983  ;;  %1135 = vadd.xlane.f32.xlu1 %v1665_v8 }
 0x2b0   :  { %1668 = vpow2.f32 %v1083_v11  ;;  %v1077_v44 = vmul.f32 1.442695, %v2264_v12  ;;  %v2268_v22 = vsub.f32 %v2116_v50, %v984_v21 }
 0x2b2   :  { %1670 = vpow2.f32 %v1077_v44  ;;  %v1079_v48 = vmul.f32 1.442695, %v2268_v22 }
 0x2b4   :  { %1672 = vpow2.f32 %v1079_v48 }
 0x2b8   :  { %v1667_v23 = vpop.eup %1666 }
 0x2b9   :  { %1145 = vadd.xlane.f32.xlu0 %v1667_v23  ;;  %v994_v24 = vpop.xlane.xlu0 %993 }
 0x2ba   :  { %v1669_v25 = vpop.eup %1668  ;;  %v2272_v38 = vsub.f32 %v2124_v27, %v994_v24 }
 0x2bb   :  { %v996_v49 = vpop.xlane.xlu1 %995  ;;  %1147 = vadd.xlane.f32.xlu1 %v1669_v25 }
 0x2bc   :  { %v1671_v14 = vpop.eup %1670  ;;  %v1089_v16 = vmul.f32 1.442695, %v2272_v38  ;;  %v2276_v42 = vsub.f32 %v2130_v41, %v996_v49 }
 0x2bd   :  { %1141 = vadd.xlane.f32.xlu0 %v1671_v14  ;;  %v990_v50 = vpop.xlane.xlu0 %989 }
 0x2be   :  { %v1673_v43 = vpop.eup %1672  ;;  %1674 = vpow2.f32 %v1089_v16  ;;  %v1091_v46 = vmul.f32 1.442695, %v2276_v42  ;;  %v2280_v18 = vsub.f32 %v2135_v55, %v990_v50 }
 0x2bf   :  { %v992_v33 = vpop.xlane.xlu1 %991  ;;  %1143 = vadd.xlane.f32.xlu1 %v1673_v43 }
 0x2c0   :  { %1676 = vpow2.f32 %v1091_v46  ;;  %v1085_v27 = vmul.f32 1.442695, %v2280_v18  ;;  %v2284_v45 = vsub.f32 %v2141_v59, %v992_v33 }
 0x2c1   :  { %v1002_v20 = vpop.xlane.xlu0 %1001 }
 0x2c2   :  { %1678 = vpow2.f32 %v1085_v27  ;;  %v1087_v41 = vmul.f32 1.442695, %v2284_v45  ;;  %v2288_v5 = vsub.f32 %v2148_v7, %v1002_v20 }
 0x2c3   :  { %v1004_v17 = vpop.xlane.xlu1 %1003 }
 0x2c4   :  { %1680 = vpow2.f32 %v1087_v41  ;;  %v1097_v55 = vmul.f32 1.442695, %v2288_v5  ;;  %v2292_v19 = vsub.f32 %v2154_v9, %v1004_v17 }
 0x2c5   :  { %v998_v29 = vpop.xlane.xlu0 %997 }
 0x2c6   :  { %1682 = vpow2.f32 %v1097_v55  ;;  %v1099_v32 = vmul.f32 1.442695, %v2292_v19  ;;  %v2296_v59 = vsub.f32 %v2159_v10, %v998_v29 }
 0x2c7   :  { %v1000_v56 = vpop.xlane.xlu1 %999 }
 0x2c8   :  { %v1675_v57 = vpop.eup %1674  ;;  %1684 = vpow2.f32 %v1099_v32  ;;  %v1093_v7 = vmul.f32 1.442695, %v2296_v59  ;;  %v2300_v60 = vsub.f32 %v2164_v15, %v1000_v56 }
 0x2c9   :  { %1153 = vadd.xlane.f32.xlu0 %v1675_v57 }
 0x2ca   :  { %v1677_v34 = vpop.eup %1676  ;;  %1686 = vpow2.f32 %v1093_v7  ;;  %v1095_v9 = vmul.f32 1.442695, %v2300_v60  ;;  %v1006_v61 = vpop.xlane.xlu0 %1005 }
 0x2cb   :  { %v2304_v1 = vsub.f32 %v2172_v26, %v1006_v61  ;;  %1155 = vadd.xlane.f32.xlu1 %v1677_v34 }
 0x2cc   :  { %v1679_v10 = vpop.eup %1678  ;;  %1688 = vpow2.f32 %v1095_v9  ;;  %v1008_v35 = vpop.xlane.xlu1 %1007 }
 0x2cd   :  { %v1101_v8 = vmul.f32 1.442695, %v2304_v1  ;;  %v2308_v11 = vsub.f32 %v2178_v30, %v1008_v35  ;;  %1149 = vadd.xlane.f32.xlu0 %v1679_v10 }
 0x2ce   :  { %v1681_v15 = vpop.eup %1680  ;;  %v1010_v21 = vpop.xlane.xlu0 %1009 }
 0x2cf   :  { %1690 = vpow2.f32 %v1101_v8  ;;  %v1103_v44 = vmul.f32 1.442695, %v2308_v11  ;;  %v2312_v48 = vsub.f32 %v2183_v36, %v1010_v21  ;;  %1151 = vadd.xlane.f32.xlu1 %v1681_v15 }
 0x2d0   :  { %v1683_v26 = vpop.eup %1682  ;;  %v1012_v23 = vpop.xlane.xlu1 %1011 }
 0x2d1   :  { %1692 = vpow2.f32 %v1103_v44  ;;  %v1105_v24 = vmul.f32 1.442695, %v2312_v48  ;;  %v2316_v25 = vsub.f32 %v2188_v37, %v1012_v23  ;;  %1161 = vadd.xlane.f32.xlu0 %v1683_v26 }
 0x2d2   :  { %v1685_v30 = vpop.eup %1684 }
 0x2d3   :  { %1694 = vpow2.f32 %v1105_v24  ;;  %v1107_v49 = vmul.f32 1.442695, %v2316_v25  ;;  %1163 = vadd.xlane.f32.xlu1 %v1685_v30 }
 0x2d4   :  { %v1687_v14 = vpop.eup %1686 }
 0x2d5   :  { %1696 = vpow2.f32 %v1107_v49  ;;  %1157 = vadd.xlane.f32.xlu0 %v1687_v14 }
 0x2d6   :  { %v1689_v36 = vpop.eup %1688 }
 0x2d7   :  { %1159 = vadd.xlane.f32.xlu1 %v1689_v36 }
 0x2d9   :  { %v1691_v16 = vpop.eup %1690 }
 0x2da   :  { %1165 = vadd.xlane.f32.xlu0 %v1691_v16 }
 0x2db   :  { %v1693_v50 = vpop.eup %1692 }
 0x2dc   :  { %1167 = vadd.xlane.f32.xlu1 %v1693_v50 }
 0x2dd   :  { %v1695_v43 = vpop.eup %1694 }
 0x2de   :  { %1169 = vadd.xlane.f32.xlu0 %v1695_v43 }
 0x2df   :  { %v1697_v46 = vpop.eup %1696 }
 0x2e0   :  { %1171 = vadd.xlane.f32.xlu1 %v1697_v46 }
 0x306   :  { %v1114_v37 = vpop.xlane.xlu0 %1113 }
 0x307   :  { %1698 = vlog2.f32 %v1114_v37 }
 0x30a   :  { %v1116_v33 = vpop.xlane.xlu1 %1115  ;;  %v1110_v27 = vpop.xlane.xlu0 %1109 }
 0x30b   :  { %1700 = vlog2.f32 %v1116_v33 }
 0x30c   :  { %1702 = vlog2.f32 %v1110_v27 }
 0x30e   :  { %v1112_v20 = vpop.xlane.xlu1 %1111 }
 0x30f   :  { %1704 = vlog2.f32 %v1112_v20 }
 0x311   :  { %v1699_v41 = vpop.eup %1698 }
 0x312   :  { %v1178_v17 = vmul.f32 0.6931472, %v1699_v41 }
 0x314   :  { %v1239_v55 = vsub.f32 %v2192_v63, %v1178_v17 }
 0x315   :  { %v1701_v29 = vpop.eup %1700 }
 0x316   :  { %v1703_v32 = vpop.eup %1702  ;;  %1271 = vst [vmem:[%s2451_s4 + $0x10] sm:$0xff] %v1239_v55  ;;  %v1180_v56 = vmul.f32 0.6931472, %v1701_v29  ;;  %v1122_v57 = vpop.xlane.xlu0 %1121 }
 0x317   :  { %v1174_v7 = vmul.f32 0.6931472, %v1703_v32  ;;  %1706 = vlog2.f32 %v1122_v57 }
 0x318   :  { %v1240_v34 = vsub.f32 %v2200_v53, %v1180_v56  ;;  %v1124_v9 = vpop.xlane.xlu1 %1123 }
 0x319   :  { %v1705_v61 = vpop.eup %1704  ;;  %v1237_v10 = vsub.f32 %v2195_v40, %v1174_v7  ;;  %1708 = vlog2.f32 %v1124_v9 }
 0x31a   :  { %1272 = vst [vmem:[%s2451_s4 + $0x18] sm:$0xff] %v1240_v34  ;;  %v1176_v63 = vmul.f32 0.6931472, %v1705_v61  ;;  %v1118_v35 = vpop.xlane.xlu0 %1117 }
 0x31b   :  { %1269 = vst [vmem:[%s2451_s4] sm:$0xff] %v1237_v10  ;;  %1710 = vlog2.f32 %v1118_v35 }
 0x31c   :  { %v1238_v8 = vsub.f32 %v2203_v52, %v1176_v63  ;;  %v1120_v15 = vpop.xlane.xlu1 %1119 }
 0x31d   :  { %1712 = vlog2.f32 %v1120_v15 }
 0x31e   :  { %1270 = vst [vmem:[%s2451_s4 + $0x8] sm:$0xff] %v1238_v8 }
 0x321   :  { %v1707_v40 = vpop.eup %1706 }
 0x322   :  { %v1186_v53 = vmul.f32 0.6931472, %v1707_v40 }
 0x323   :  { %v1709_v21 = vpop.eup %1708 }
 0x324   :  { %v1243_v44 = vsub.f32 %v2208_v13, %v1186_v53  ;;  %v1188_v26 = vmul.f32 0.6931472, %v1709_v21 }
 0x325   :  { %v1711_v23 = vpop.eup %1710 }
 0x326   :  { %1275 = vst [vmem:[%s2451_s4 + $0x30] sm:$0xff] %v1243_v44  ;;  %v1244_v24 = vsub.f32 %v2212_v54, %v1188_v26  ;;  %v1182_v52 = vmul.f32 0.6931472, %v1711_v23  ;;  %v1130_v30 = vpop.xlane.xlu0 %1129 }
 0x327   :  { %v1713_v49 = vpop.eup %1712  ;;  %1714 = vlog2.f32 %v1130_v30 }
 0x328   :  { %1276 = vst [vmem:[%s2451_s4 + $0x38] sm:$0xff] %v1244_v24  ;;  %v1241_v14 = vsub.f32 %v2216_v58, %v1182_v52  ;;  %v1184_v36 = vmul.f32 0.6931472, %v1713_v49  ;;  %v1132_v13 = vpop.xlane.xlu1 %1131 }
 0x329   :  { %1716 = vlog2.f32 %v1132_v13 }
 0x32a   :  { %1273 = vst [vmem:[%s2451_s4 + $0x20] sm:$0xff] %v1241_v14  ;;  %v1242_v16 = vsub.f32 %v2220_v0, %v1184_v36  ;;  %v1126_v54 = vpop.xlane.xlu0 %1125 }
 0x32b   :  { %1718 = vlog2.f32 %v1126_v54 }
 0x32c   :  { %1274 = vst [vmem:[%s2451_s4 + $0x28] sm:$0xff] %v1242_v16  ;;  %v1128_v50 = vpop.xlane.xlu1 %1127 }
 0x32d   :  { %1720 = vlog2.f32 %v1128_v50 }
 0x331   :  { %v1715_v43 = vpop.eup %1714 }
 0x332   :  { %v1194_v46 = vmul.f32 0.6931472, %v1715_v43 }
 0x333   :  { %v1717_v58 = vpop.eup %1716 }
 0x334   :  { %v1247_v37 = vsub.f32 %v2224_v2, %v1194_v46  ;;  %v1196_v33 = vmul.f32 0.6931472, %v1717_v58 }
 0x335   :  { %v1719_v27 = vpop.eup %1718 }
 0x336   :  { %1279 = vst [vmem:[%s2451_s4 + $0x50] sm:$0xff] %v1247_v37  ;;  %v1248_v0 = vsub.f32 %v2228_v4, %v1196_v33  ;;  %v1190_v20 = vmul.f32 0.6931472, %v1719_v27  ;;  %v1138_v41 = vpop.xlane.xlu0 %1137 }
 0x337   :  { %v1721_v17 = vpop.eup %1720  ;;  %1722 = vlog2.f32 %v1138_v41 }
 0x338   :  { %1280 = vst [vmem:[%s2451_s4 + $0x58] sm:$0xff] %v1248_v0  ;;  %v1245_v55 = vsub.f32 %v2232_v28, %v1190_v20  ;;  %v1192_v29 = vmul.f32 0.6931472, %v1721_v17  ;;  %v1140_v2 = vpop.xlane.xlu1 %1139 }
 0x339   :  { %1724 = vlog2.f32 %v1140_v2 }
 0x33a   :  { %1277 = vst [vmem:[%s2451_s4 + $0x40] sm:$0xff] %v1245_v55  ;;  %v1246_v32 = vsub.f32 %v2236_v39, %v1192_v29  ;;  %v1134_v4 = vpop.xlane.xlu0 %1133 }
 0x33b   :  { %1726 = vlog2.f32 %v1134_v4 }
 0x33c   :  { %1278 = vst [vmem:[%s2451_s4 + $0x48] sm:$0xff] %v1246_v32  ;;  %v1136_v56 = vpop.xlane.xlu1 %1135 }
 0x33d   :  { %1728 = vlog2.f32 %v1136_v56 }
 0x341   :  { %v1723_v57 = vpop.eup %1722 }
 0x342   :  { %v1202_v7 = vmul.f32 0.6931472, %v1723_v57 }
 0x343   :  { %v1725_v28 = vpop.eup %1724 }
 0x344   :  { %v1251_v34 = vsub.f32 %v2240_v51, %v1202_v7  ;;  %v1204_v9 = vmul.f32 0.6931472, %v1725_v28 }
 0x345   :  { %v1727_v61 = vpop.eup %1726 }
 0x346   :  { %1283 = vst [vmem:[%s2451_s4 + $0x70] sm:$0xff] %v1251_v34  ;;  %v1252_v39 = vsub.f32 %v2244_v3, %v1204_v9  ;;  %v1198_v10 = vmul.f32 0.6931472, %v1727_v61  ;;  %v1146_v63 = vpop.xlane.xlu0 %1145 }
 0x347   :  { %v1729_v35 = vpop.eup %1728  ;;  %1730 = vlog2.f32 %v1146_v63 }
 0x348   :  { %1284 = vst [vmem:[%s2451_s4 + $0x78] sm:$0xff] %v1252_v39  ;;  %v1249_v8 = vsub.f32 %v2248_v47, %v1198_v10  ;;  %v1200_v15 = vmul.f32 0.6931472, %v1729_v35  ;;  %v1148_v51 = vpop.xlane.xlu1 %1147 }
 0x349   :  { %1732 = vlog2.f32 %v1148_v51 }
 0x34a   :  { %1281 = vst [vmem:[%s2451_s4 + $0x60] sm:$0xff] %v1249_v8  ;;  %v1250_v40 = vsub.f32 %v2252_v31, %v1200_v15  ;;  %v1142_v3 = vpop.xlane.xlu0 %1141 }
 0x34b   :  { %1734 = vlog2.f32 %v1142_v3 }
 0x34c   :  { %1282 = vst [vmem:[%s2451_s4 + $0x68] sm:$0xff] %v1250_v40  ;;  %v1144_v53 = vpop.xlane.xlu1 %1143 }
 0x34d   :  { %1736 = vlog2.f32 %v1144_v53 }
 0x351   :  { %v1731_v21 = vpop.eup %1730 }
 0x352   :  { %v1210_v44 = vmul.f32 0.6931472, %v1731_v21 }
 0x353   :  { %v1733_v47 = vpop.eup %1732 }
 0x354   :  { %v1255_v26 = vsub.f32 %v2256_v62, %v1210_v44  ;;  %v1212_v23 = vmul.f32 0.6931472, %v1733_v47 }
 0x355   :  { %v1735_v24 = vpop.eup %1734 }
 0x356   :  { %1287 = vst [vmem:[%s2451_s4 + $0x90] sm:$0xff] %v1255_v26  ;;  %v1256_v31 = vsub.f32 %v2260_v6, %v1212_v23  ;;  %v1206_v52 = vmul.f32 0.6931472, %v1735_v24  ;;  %v1154_v30 = vpop.xlane.xlu0 %1153 }
 0x357   :  { %v1737_v49 = vpop.eup %1736  ;;  %1738 = vlog2.f32 %v1154_v30 }
 0x358   :  { %1288 = vst [vmem:[%s2451_s4 + $0x98] sm:$0xff] %v1256_v31  ;;  %v1253_v14 = vsub.f32 %v2264_v12, %v1206_v52  ;;  %v1208_v36 = vmul.f32 0.6931472, %v1737_v49  ;;  %v1156_v62 = vpop.xlane.xlu1 %1155 }
 0x359   :  { %1740 = vlog2.f32 %v1156_v62 }
 0x35a   :  { %1285 = vst [vmem:[%s2451_s4 + $0x80] sm:$0xff] %v1253_v14  ;;  %v1254_v13 = vsub.f32 %v2268_v22, %v1208_v36  ;;  %v1150_v6 = vpop.xlane.xlu0 %1149 }
 0x35b   :  { %1742 = vlog2.f32 %v1150_v6 }
 0x35c   :  { %1286 = vst [vmem:[%s2451_s4 + $0x88] sm:$0xff] %v1254_v13  ;;  %v1152_v16 = vpop.xlane.xlu1 %1151 }
 0x35d   :  { %1744 = vlog2.f32 %v1152_v16 }
 0x35e   :  { %v1162_v54 = vpop.xlane.xlu0 %1161 }
 0x35f   :  { %1746 = vlog2.f32 %v1162_v54 }
 0x360   :  { %v1164_v12 = vpop.xlane.xlu1 %1163 }
 0x361   :  { %v1739_v50 = vpop.eup %1738  ;;  %1748 = vlog2.f32 %v1164_v12 }
 0x362   :  { %v1218_v43 = vmul.f32 0.6931472, %v1739_v50  ;;  %v1158_v46 = vpop.xlane.xlu0 %1157 }
 0x363   :  { %v1741_v58 = vpop.eup %1740  ;;  %1750 = vlog2.f32 %v1158_v46 }
 0x364   :  { %v1259_v37 = vsub.f32 %v2272_v38, %v1218_v43  ;;  %v1220_v22 = vmul.f32 0.6931472, %v1741_v58  ;;  %v1160_v33 = vpop.xlane.xlu1 %1159 }
 0x365   :  { %v1743_v27 = vpop.eup %1742  ;;  %1752 = vlog2.f32 %v1160_v33 }
 0x366   :  { %1291 = vst [vmem:[%s2451_s4 + $0xb0] sm:$0xff] %v1259_v37  ;;  %v1260_v0 = vsub.f32 %v2276_v42, %v1220_v22  ;;  %v1214_v20 = vmul.f32 0.6931472, %v1743_v27 }
 0x367   :  { %v1745_v41 = vpop.eup %1744  ;;  %v1166_v17 = vpop.xlane.xlu0 %1165 }
 0x368   :  { %1292 = vst [vmem:[%s2451_s4 + $0xb8] sm:$0xff] %v1260_v0  ;;  %v1257_v55 = vsub.f32 %v2280_v18, %v1214_v20  ;;  %v1216_v38 = vmul.f32 0.6931472, %v1745_v41  ;;  %1754 = vlog2.f32 %v1166_v17 }
 0x369   :  { %v1747_v29 = vpop.eup %1746  ;;  %v1168_v2 = vpop.xlane.xlu1 %1167 }
 0x36a   :  { %1289 = vst [vmem:[%s2451_s4 + $0xa0] sm:$0xff] %v1257_v55  ;;  %v1258_v32 = vsub.f32 %v2284_v45, %v1216_v38  ;;  %v1226_v42 = vmul.f32 0.6931472, %v1747_v29  ;;  %1756 = vlog2.f32 %v1168_v2 }
 0x36b   :  { %v1749_v4 = vpop.eup %1748  ;;  %v1170_v56 = vpop.xlane.xlu0 %1169 }
 0x36c   :  { %1290 = vst [vmem:[%s2451_s4 + $0xa8] sm:$0xff] %v1258_v32  ;;  %v1263_v18 = vsub.f32 %v2288_v5, %v1226_v42  ;;  %v1228_v57 = vmul.f32 0.6931472, %v1749_v4  ;;  %1758 = vlog2.f32 %v1170_v56 }
 0x36d   :  { %v1751_v7 = vpop.eup %1750  ;;  %v1172_v28 = vpop.xlane.xlu1 %1171 }
 0x36e   :  { %1295 = vst [vmem:[%s2451_s4 + $0xd0] sm:$0xff] %v1263_v18  ;;  %v1264_v45 = vsub.f32 %v2292_v19, %v1228_v57  ;;  %v1222_v34 = vmul.f32 0.6931472, %v1751_v7  ;;  %1760 = vlog2.f32 %v1172_v28 }
 0x36f   :  { %v1753_v9 = vpop.eup %1752 }
 0x370   :  { %1296 = vst [vmem:[%s2451_s4 + $0xd8] sm:$0xff] %v1264_v45  ;;  %v1261_v61 = vsub.f32 %v2296_v59, %v1222_v34  ;;  %v1224_v5 = vmul.f32 0.6931472, %v1753_v9 }
 0x372   :  { %v1755_v39 = vpop.eup %1754  ;;  %1293 = vst [vmem:[%s2451_s4 + $0xc0] sm:$0xff] %v1261_v61  ;;  %v1262_v10 = vsub.f32 %v2300_v60, %v1224_v5 }
 0x373   :  { %v1230_v63 = vmul.f32 0.6931472, %v1755_v39 }
 0x374   :  { %v1757_v35 = vpop.eup %1756  ;;  %1294 = vst [vmem:[%s2451_s4 + $0xc8] sm:$0xff] %v1262_v10 }
 0x375   :  { %v1265_v19 = vsub.f32 %v2304_v1, %v1230_v63  ;;  %v1232_v8 = vmul.f32 0.6931472, %v1757_v35 }
 0x376   :  { %v1759_v15 = vpop.eup %1758 }
 0x377   :  { %1297 = vst [vmem:[%s2451_s4 + $0xe0] sm:$0xff] %v1265_v19  ;;  %v1266_v59 = vsub.f32 %v2308_v11, %v1232_v8  ;;  %v1234_v51 = vmul.f32 0.6931472, %v1759_v15 }
 0x378   :  { %v1761_v40 = vpop.eup %1760 }
 0x379   :  { %1298 = vst [vmem:[%s2451_s4 + $0xe8] sm:$0xff] %v1266_v59  ;;  %v1267_v60 = vsub.f32 %v2312_v48, %v1234_v51  ;;  %v1236_v3 = vmul.f32 0.6931472, %v1761_v40 }
 0x37b   :  { %1299 = vst [vmem:[%s2451_s4 + $0xf0] sm:$0xff] %v1267_v60  ;;  %v1268_v1 = vsub.f32 %v2316_v25, %v1236_v3 }
 0x37d   :  { %1300 = vst [vmem:[%s2451_s4 + $0xf8] sm:$0xff] %v1268_v1 }

</bundles_post_ra>
